<compile_context>
chip_gen: v5e
topology: v5e:2x2
jax: 0.10.0
libtpu: 0.0.40
codegen_flags: <defaults>
</compile_context>

<pallas_src>
import functools
import math

import jax
import jax.numpy as jnp
from jax import lax
from jax.experimental import pallas as pl
from jax.experimental.pallas import tpu as pltpu


# ---------------------------------------------------------------------------
# Fully fused MHA kernel: one grid step == one batch element.
# ---------------------------------------------------------------------------
def _fused_mha_kernel(xq_ref, xk_ref, xv_ref,
                      wq_ref, bq_ref, wk_ref, bk_ref, wv_ref, bv_ref,
                      wo_ref, bo_ref,
                      o_ref, attn_ref, *, C, H, W):
    """Refs:
      xq/xk/xv : (C, H, W) VMEM   -- raw inputs for this batch element
      w*       : (C, C)    SMEM   -- 1x1-conv weights
      b*       : (C,)      SMEM   -- 1x1-conv biases
      o_ref    : (C, H, W) VMEM   -- final output (after W_o)
      attn_ref : (C, H, H) VMEM   -- attention weights
    """
    scale = 1.0 / math.sqrt(float(W))  # d_k == W (last dim of the 5-D split tensor)

    def project(x_ref, w_ref, b_ref):
        # 1x1 conv == per-pixel channel mixing.  C is tiny, so do it as
        # scalar-coefficient FMAs on whole (H, W) planes; everything stays in VMEM
        # and no relayout is needed between the projection and the attention.
        outs = []
        for o_idx in range(C):
            acc = w_ref[o_idx, 0] * x_ref[0]
            for c_idx in range(1, C):
                acc = acc + w_ref[o_idx, c_idx] * x_ref[c_idx]
            outs.append(acc + b_ref[o_idx])
        return outs

    q_ch = project(xq_ref, wq_ref, bq_ref)
    k_ch = project(xk_ref, wk_ref, bk_ref)
    v_ch = project(xv_ref, wv_ref, bv_ref)

    # TODO(synk): optional additive `mask * -1e9` term not wired in (the reference
    # forward is called with mask=None).
    att_out = []
    for c_idx in range(C):
        q = q_ch[c_idx] * scale                       # fold 1/sqrt(d_k) into q
        k = k_ch[c_idx]
        # q @ k^T without materializing a transposed copy of k.
        s = lax.dot_general(q, k,
                            dimension_numbers=(((1,), (1,)), ((), ())),
                            preferred_element_type=jnp.float32)       # (H, H)
        m = jnp.max(s, axis=-1, keepdims=True)
        e = jnp.exp(s - m)
        denom = jnp.sum(e, axis=-1, keepdims=True)
        p = e * pl.reciprocal(denom, approx=False)    # softmax over last dim
        attn_ref[c_idx] = p
        att_out.append(jnp.dot(p, v_ch[c_idx], preferred_element_type=jnp.float32))

    # Output 1x1 conv (W_o), again as scalar-coefficient FMAs over channels.
    for o_idx in range(C):
        acc = wo_ref[o_idx, 0] * att_out[0]
        for c_idx in range(1, C):
            acc = acc + wo_ref[o_idx, c_idx] * att_out[c_idx]
        o_ref[o_idx] = acc + bo_ref[o_idx]


# ---------------------------------------------------------------------------
# Full MultiHeadAttention forward (single pallas_call)
# ---------------------------------------------------------------------------
def multi_head_attention(params, q_in, k_in, v_in, num_heads):
    B, C, H, W = q_in.shape
    assert C % num_heads == 0
    head_dim = C // num_heads
    G = B * C

    # Pure metadata reshapes: (B, C, H, W) -> (B*C, H, W)  (flat order unchanged).
    xq = q_in.reshape(G, H, W)
    xk = k_in.reshape(G, H, W)
    xv = v_in.reshape(G, H, W)

    wq = params["wq_w"].reshape(C, C); bq = params["wq_b"]
    wk = params["wk_w"].reshape(C, C); bk = params["wk_b"]
    wv = params["wv_w"].reshape(C, C); bv = params["wv_b"]
    wo = params["wo_w"].reshape(C, C); bo = params["wo_b"]

    kern = functools.partial(_fused_mha_kernel, C=C, H=H, W=W)
    smem = pl.BlockSpec(memory_space=pltpu.MemorySpace.SMEM)

    out_g, attn_g = pl.pallas_call(
        kern,
        out_shape=(jax.ShapeDtypeStruct((G, H, W), jnp.float32),
                   jax.ShapeDtypeStruct((G, H, H), jnp.float32)),
        grid=(B,),
        in_specs=[
            pl.BlockSpec((C, H, W), lambda b: (b, 0, 0)),   # xq
            pl.BlockSpec((C, H, W), lambda b: (b, 0, 0)),   # xk
            pl.BlockSpec((C, H, W), lambda b: (b, 0, 0)),   # xv
            smem, smem,                                     # wq, bq
            smem, smem,                                     # wk, bk
            smem, smem,                                     # wv, bv
            smem, smem,                                     # wo, bo
        ],
        out_specs=(
            pl.BlockSpec((C, H, W), lambda b: (b, 0, 0)),
            pl.BlockSpec((C, H, H), lambda b: (b, 0, 0)),
        ),
        compiler_params=pltpu.CompilerParams(
            dimension_semantics=("parallel",),   # lets v7x megacore split the batch axis
        ),
    )(xq, xk, xv, wq, bq, wk, bk, wv, bv, wo, bo)

    out = out_g.reshape(B, C, H, W)
    attn = attn_g.reshape(B, num_heads, head_dim, H, H)
    return out, attn


# ---------------------------------------------------------------------------
# Pure-JAX reference (for correctness check)
# ---------------------------------------------------------------------------
def reference(params, q_in, k_in, v_in, num_heads):
    def conv(x, w, b):
        Cout, Cin = w.shape[0], w.shape[1]
        y = jnp.einsum("oc,bchw->bohw", w.reshape(Cout, Cin), x)
        return y + b[None, :, None, None]

    B, C, H, W = q_in.shape
    hd = C // num_heads
    q = conv(q_in, params["wq_w"], params["wq_b"]).reshape(B, num_heads, hd, H, W)
    k = conv(k_in, params["wk_w"], params["wk_b"]).reshape(B, num_heads, hd, H, W)
    v = conv(v_in, params["wv_w"], params["wv_b"]).reshape(B, num_heads, hd, H, W)
    s = jnp.einsum("bnchw,bnckw->bnchk", q, k) / jnp.sqrt(jnp.float32(W))
    p = jax.nn.softmax(s, axis=-1)
    o = jnp.einsum("bnchk,bnckw->bnchw", p, v).reshape(B, C, H, W)
    o = conv(o, params["wo_w"], params["wo_b"])
    return o, p


if __name__ == "__main__":
    B, C, H, W = 2, 4, 16, 16
    num_heads = 2

    key = jax.random.PRNGKey(0)
    keys = jax.random.split(key, 12)

    def winit(k):
        return (0.1 * jax.random.normal(k, (C, C, 1, 1))).astype(jnp.float32)

    def binit(k):
        return (0.1 * jax.random.normal(k, (C,))).astype(jnp.float32)

    params = {
        "wq_w": winit(keys[0]), "wq_b": binit(keys[1]),
        "wk_w": winit(keys[2]), "wk_b": binit(keys[3]),
        "wv_w": winit(keys[4]), "wv_b": binit(keys[5]),
        "wo_w": winit(keys[6]), "wo_b": binit(keys[7]),
    }

    q_in = jax.random.normal(keys[8], (B, C, H, W), dtype=jnp.float32)
    k_in = jax.random.normal(keys[9], (B, C, H, W), dtype=jnp.float32)
    v_in = jax.random.normal(keys[10], (B, C, H, W), dtype=jnp.float32)

    out, attn = multi_head_attention(params, q_in, k_in, v_in, num_heads)
    out = jax.block_until_ready(out)
    attn = jax.block_until_ready(attn)

    ref_out, ref_attn = reference(params, q_in, k_in, v_in, num_heads)

    assert out.shape == (B, C, H, W)
    assert attn.shape == (B, num_heads, C // num_heads, H, H)
    assert jnp.allclose(out, ref_out, rtol=1e-4, atol=1e-5), "output mismatch"
    assert jnp.allclose(attn, ref_attn, rtol=1e-4, atol=1e-5), "attention mismatch"

    print("KERNEL_OK")
</pallas_src>

<mosaic_0001>
module attributes {stable_mosaic.version = 11 : i64} {
  func.func @_fused_mha_kernel(%arg0: i32, %arg1: memref<4x16x16xf32, #tpu.memory_space<vmem>>, %arg2: memref<4x16x16xf32, #tpu.memory_space<vmem>>, %arg3: memref<4x16x16xf32, #tpu.memory_space<vmem>>, %arg4: memref<4x4xf32, #tpu.memory_space<smem>>, %arg5: memref<4xf32, #tpu.memory_space<smem>>, %arg6: memref<4x4xf32, #tpu.memory_space<smem>>, %arg7: memref<4xf32, #tpu.memory_space<smem>>, %arg8: memref<4x4xf32, #tpu.memory_space<smem>>, %arg9: memref<4xf32, #tpu.memory_space<smem>>, %arg10: memref<4x4xf32, #tpu.memory_space<smem>>, %arg11: memref<4xf32, #tpu.memory_space<smem>>, %arg12: memref<4x16x16xf32, #tpu.memory_space<vmem>>, %arg13: memref<4x16x16xf32, #tpu.memory_space<vmem>>) attributes {dimension_semantics = [#tpu.dimension_semantics<parallel>], iteration_bounds = array<i64: 2>, scalar_prefetch = 0 : i64, scratch_operands = 0 : i64, tpu.core_type = #tpu.core_type<tc>, window_params = [{transform_indices = @transform_0, window_bounds = array<i64: 4, 16, 16>}, {transform_indices = @transform_1, window_bounds = array<i64: 4, 16, 16>}, {transform_indices = @transform_2, window_bounds = array<i64: 4, 16, 16>}, {transform_indices = @transform_3, window_bounds = array<i64: 4, 4>}, {transform_indices = @transform_4, window_bounds = array<i64: 4>}, {transform_indices = @transform_5, window_bounds = array<i64: 4, 4>}, {transform_indices = @transform_6, window_bounds = array<i64: 4>}, {transform_indices = @transform_7, window_bounds = array<i64: 4, 4>}, {transform_indices = @transform_8, window_bounds = array<i64: 4>}, {transform_indices = @transform_9, window_bounds = array<i64: 4, 4>}, {transform_indices = @transform_10, window_bounds = array<i64: 4>}, {transform_indices = @transform_11, window_bounds = array<i64: 4, 16, 16>}, {transform_indices = @transform_12, window_bounds = array<i64: 4, 16, 16>}]} {
    %c0 = arith.constant 0 : index
    %c0_0 = arith.constant 0 : index
    %0 = memref.load %arg4[%c0, %c0_0] : memref<4x4xf32, #tpu.memory_space<smem>>
    %c0_1 = arith.constant 0 : index
    %c0_2 = arith.constant 0 : index
    %c0_3 = arith.constant 0 : index
    %1 = vector.load %arg1[%c0_1, %c0_2, %c0_3] : memref<4x16x16xf32, #tpu.memory_space<vmem>>, vector<1x16x16xf32>
    %2 = vector.shape_cast %1 : vector<1x16x16xf32> to vector<16x16xf32>
    %3 = vector.broadcast %0 : f32 to vector<16x16xf32>
    %4 = arith.mulf %3, %2 : vector<16x16xf32>
    %c0_4 = arith.constant 0 : index
    %c1 = arith.constant 1 : index
    %5 = memref.load %arg4[%c0_4, %c1] : memref<4x4xf32, #tpu.memory_space<smem>>
    %c1_5 = arith.constant 1 : index
    %c0_6 = arith.constant 0 : index
    %c0_7 = arith.constant 0 : index
    %6 = vector.load %arg1[%c1_5, %c0_6, %c0_7] : memref<4x16x16xf32, #tpu.memory_space<vmem>>, vector<1x16x16xf32>
    %7 = vector.shape_cast %6 : vector<1x16x16xf32> to vector<16x16xf32>
    %8 = vector.broadcast %5 : f32 to vector<16x16xf32>
    %9 = arith.mulf %8, %7 : vector<16x16xf32>
    %10 = arith.addf %4, %9 : vector<16x16xf32>
    %c0_8 = arith.constant 0 : index
    %c2 = arith.constant 2 : index
    %11 = memref.load %arg4[%c0_8, %c2] : memref<4x4xf32, #tpu.memory_space<smem>>
    %c2_9 = arith.constant 2 : index
    %c0_10 = arith.constant 0 : index
    %c0_11 = arith.constant 0 : index
    %12 = vector.load %arg1[%c2_9, %c0_10, %c0_11] : memref<4x16x16xf32, #tpu.memory_space<vmem>>, vector<1x16x16xf32>
    %13 = vector.shape_cast %12 : vector<1x16x16xf32> to vector<16x16xf32>
    %14 = vector.broadcast %11 : f32 to vector<16x16xf32>
    %15 = arith.mulf %14, %13 : vector<16x16xf32>
    %16 = arith.addf %10, %15 : vector<16x16xf32>
    %c0_12 = arith.constant 0 : index
    %c3 = arith.constant 3 : index
    %17 = memref.load %arg4[%c0_12, %c3] : memref<4x4xf32, #tpu.memory_space<smem>>
    %c3_13 = arith.constant 3 : index
    %c0_14 = arith.constant 0 : index
    %c0_15 = arith.constant 0 : index
    %18 = vector.load %arg1[%c3_13, %c0_14, %c0_15] : memref<4x16x16xf32, #tpu.memory_space<vmem>>, vector<1x16x16xf32>
    %19 = vector.shape_cast %18 : vector<1x16x16xf32> to vector<16x16xf32>
    %20 = vector.broadcast %17 : f32 to vector<16x16xf32>
    %21 = arith.mulf %20, %19 : vector<16x16xf32>
    %22 = arith.addf %16, %21 : vector<16x16xf32>
    %c0_16 = arith.constant 0 : index
    %23 = memref.load %arg5[%c0_16] : memref<4xf32, #tpu.memory_space<smem>>
    %24 = vector.broadcast %23 : f32 to vector<16x16xf32>
    %25 = arith.addf %22, %24 : vector<16x16xf32>
    %c1_17 = arith.constant 1 : index
    %c0_18 = arith.constant 0 : index
    %26 = memref.load %arg4[%c1_17, %c0_18] : memref<4x4xf32, #tpu.memory_space<smem>>
    %c0_19 = arith.constant 0 : index
    %c0_20 = arith.constant 0 : index
    %c0_21 = arith.constant 0 : index
    %27 = vector.load %arg1[%c0_19, %c0_20, %c0_21] : memref<4x16x16xf32, #tpu.memory_space<vmem>>, vector<1x16x16xf32>
    %28 = vector.shape_cast %27 : vector<1x16x16xf32> to vector<16x16xf32>
    %29 = vector.broadcast %26 : f32 to vector<16x16xf32>
    %30 = arith.mulf %29, %28 : vector<16x16xf32>
    %c1_22 = arith.constant 1 : index
    %c1_23 = arith.constant 1 : index
    %31 = memref.load %arg4[%c1_22, %c1_23] : memref<4x4xf32, #tpu.memory_space<smem>>
    %c1_24 = arith.constant 1 : index
    %c0_25 = arith.constant 0 : index
    %c0_26 = arith.constant 0 : index
    %32 = vector.load %arg1[%c1_24, %c0_25, %c0_26] : memref<4x16x16xf32, #tpu.memory_space<vmem>>, vector<1x16x16xf32>
    %33 = vector.shape_cast %32 : vector<1x16x16xf32> to vector<16x16xf32>
    %34 = vector.broadcast %31 : f32 to vector<16x16xf32>
    %35 = arith.mulf %34, %33 : vector<16x16xf32>
    %36 = arith.addf %30, %35 : vector<16x16xf32>
    %c1_27 = arith.constant 1 : index
    %c2_28 = arith.constant 2 : index
    %37 = memref.load %arg4[%c1_27, %c2_28] : memref<4x4xf32, #tpu.memory_space<smem>>
    %c2_29 = arith.constant 2 : index
    %c0_30 = arith.constant 0 : index
    %c0_31 = arith.constant 0 : index
    %38 = vector.load %arg1[%c2_29, %c0_30, %c0_31] : memref<4x16x16xf32, #tpu.memory_space<vmem>>, vector<1x16x16xf32>
    %39 = vector.shape_cast %38 : vector<1x16x16xf32> to vector<16x16xf32>
    %40 = vector.broadcast %37 : f32 to vector<16x16xf32>
    %41 = arith.mulf %40, %39 : vector<16x16xf32>
    %42 = arith.addf %36, %41 : vector<16x16xf32>
    %c1_32 = arith.constant 1 : index
    %c3_33 = arith.constant 3 : index
    %43 = memref.load %arg4[%c1_32, %c3_33] : memref<4x4xf32, #tpu.memory_space<smem>>
    %c3_34 = arith.constant 3 : index
    %c0_35 = arith.constant 0 : index
    %c0_36 = arith.constant 0 : index
    %44 = vector.load %arg1[%c3_34, %c0_35, %c0_36] : memref<4x16x16xf32, #tpu.memory_space<vmem>>, vector<1x16x16xf32>
    %45 = vector.shape_cast %44 : vector<1x16x16xf32> to vector<16x16xf32>
    %46 = vector.broadcast %43 : f32 to vector<16x16xf32>
    %47 = arith.mulf %46, %45 : vector<16x16xf32>
    %48 = arith.addf %42, %47 : vector<16x16xf32>
    %c1_37 = arith.constant 1 : index
    %49 = memref.load %arg5[%c1_37] : memref<4xf32, #tpu.memory_space<smem>>
    %50 = vector.broadcast %49 : f32 to vector<16x16xf32>
    %51 = arith.addf %48, %50 : vector<16x16xf32>
    %c2_38 = arith.constant 2 : index
    %c0_39 = arith.constant 0 : index
    %52 = memref.load %arg4[%c2_38, %c0_39] : memref<4x4xf32, #tpu.memory_space<smem>>
    %c0_40 = arith.constant 0 : index
    %c0_41 = arith.constant 0 : index
    %c0_42 = arith.constant 0 : index
    %53 = vector.load %arg1[%c0_40, %c0_41, %c0_42] : memref<4x16x16xf32, #tpu.memory_space<vmem>>, vector<1x16x16xf32>
    %54 = vector.shape_cast %53 : vector<1x16x16xf32> to vector<16x16xf32>
    %55 = vector.broadcast %52 : f32 to vector<16x16xf32>
    %56 = arith.mulf %55, %54 : vector<16x16xf32>
    %c2_43 = arith.constant 2 : index
    %c1_44 = arith.constant 1 : index
    %57 = memref.load %arg4[%c2_43, %c1_44] : memref<4x4xf32, #tpu.memory_space<smem>>
    %c1_45 = arith.constant 1 : index
    %c0_46 = arith.constant 0 : index
    %c0_47 = arith.constant 0 : index
    %58 = vector.load %arg1[%c1_45, %c0_46, %c0_47] : memref<4x16x16xf32, #tpu.memory_space<vmem>>, vector<1x16x16xf32>
    %59 = vector.shape_cast %58 : vector<1x16x16xf32> to vector<16x16xf32>
    %60 = vector.broadcast %57 : f32 to vector<16x16xf32>
    %61 = arith.mulf %60, %59 : vector<16x16xf32>
    %62 = arith.addf %56, %61 : vector<16x16xf32>
    %c2_48 = arith.constant 2 : index
    %c2_49 = arith.constant 2 : index
    %63 = memref.load %arg4[%c2_48, %c2_49] : memref<4x4xf32, #tpu.memory_space<smem>>
    %c2_50 = arith.constant 2 : index
    %c0_51 = arith.constant 0 : index
    %c0_52 = arith.constant 0 : index
    %64 = vector.load %arg1[%c2_50, %c0_51, %c0_52] : memref<4x16x16xf32, #tpu.memory_space<vmem>>, vector<1x16x16xf32>
    %65 = vector.shape_cast %64 : vector<1x16x16xf32> to vector<16x16xf32>
    %66 = vector.broadcast %63 : f32 to vector<16x16xf32>
    %67 = arith.mulf %66, %65 : vector<16x16xf32>
    %68 = arith.addf %62, %67 : vector<16x16xf32>
    %c2_53 = arith.constant 2 : index
    %c3_54 = arith.constant 3 : index
    %69 = memref.load %arg4[%c2_53, %c3_54] : memref<4x4xf32, #tpu.memory_space<smem>>
    %c3_55 = arith.constant 3 : index
    %c0_56 = arith.constant 0 : index
    %c0_57 = arith.constant 0 : index
    %70 = vector.load %arg1[%c3_55, %c0_56, %c0_57] : memref<4x16x16xf32, #tpu.memory_space<vmem>>, vector<1x16x16xf32>
    %71 = vector.shape_cast %70 : vector<1x16x16xf32> to vector<16x16xf32>
    %72 = vector.broadcast %69 : f32 to vector<16x16xf32>
    %73 = arith.mulf %72, %71 : vector<16x16xf32>
    %74 = arith.addf %68, %73 : vector<16x16xf32>
    %c2_58 = arith.constant 2 : index
    %75 = memref.load %arg5[%c2_58] : memref<4xf32, #tpu.memory_space<smem>>
    %76 = vector.broadcast %75 : f32 to vector<16x16xf32>
    %77 = arith.addf %74, %76 : vector<16x16xf32>
    %c3_59 = arith.constant 3 : index
    %c0_60 = arith.constant 0 : index
    %78 = memref.load %arg4[%c3_59, %c0_60] : memref<4x4xf32, #tpu.memory_space<smem>>
    %c0_61 = arith.constant 0 : index
    %c0_62 = arith.constant 0 : index
    %c0_63 = arith.constant 0 : index
    %79 = vector.load %arg1[%c0_61, %c0_62, %c0_63] : memref<4x16x16xf32, #tpu.memory_space<vmem>>, vector<1x16x16xf32>
    %80 = vector.shape_cast %79 : vector<1x16x16xf32> to vector<16x16xf32>
    %81 = vector.broadcast %78 : f32 to vector<16x16xf32>
    %82 = arith.mulf %81, %80 : vector<16x16xf32>
    %c3_64 = arith.constant 3 : index
    %c1_65 = arith.constant 1 : index
    %83 = memref.load %arg4[%c3_64, %c1_65] : memref<4x4xf32, #tpu.memory_space<smem>>
    %c1_66 = arith.constant 1 : index
    %c0_67 = arith.constant 0 : index
    %c0_68 = arith.constant 0 : index
    %84 = vector.load %arg1[%c1_66, %c0_67, %c0_68] : memref<4x16x16xf32, #tpu.memory_space<vmem>>, vector<1x16x16xf32>
    %85 = vector.shape_cast %84 : vector<1x16x16xf32> to vector<16x16xf32>
    %86 = vector.broadcast %83 : f32 to vector<16x16xf32>
    %87 = arith.mulf %86, %85 : vector<16x16xf32>
    %88 = arith.addf %82, %87 : vector<16x16xf32>
    %c3_69 = arith.constant 3 : index
    %c2_70 = arith.constant 2 : index
    %89 = memref.load %arg4[%c3_69, %c2_70] : memref<4x4xf32, #tpu.memory_space<smem>>
    %c2_71 = arith.constant 2 : index
    %c0_72 = arith.constant 0 : index
    %c0_73 = arith.constant 0 : index
    %90 = vector.load %arg1[%c2_71, %c0_72, %c0_73] : memref<4x16x16xf32, #tpu.memory_space<vmem>>, vector<1x16x16xf32>
    %91 = vector.shape_cast %90 : vector<1x16x16xf32> to vector<16x16xf32>
    %92 = vector.broadcast %89 : f32 to vector<16x16xf32>
    %93 = arith.mulf %92, %91 : vector<16x16xf32>
    %94 = arith.addf %88, %93 : vector<16x16xf32>
    %c3_74 = arith.constant 3 : index
    %c3_75 = arith.constant 3 : index
    %95 = memref.load %arg4[%c3_74, %c3_75] : memref<4x4xf32, #tpu.memory_space<smem>>
    %c3_76 = arith.constant 3 : index
    %c0_77 = arith.constant 0 : index
    %c0_78 = arith.constant 0 : index
    %96 = vector.load %arg1[%c3_76, %c0_77, %c0_78] : memref<4x16x16xf32, #tpu.memory_space<vmem>>, vector<1x16x16xf32>
    %97 = vector.shape_cast %96 : vector<1x16x16xf32> to vector<16x16xf32>
    %98 = vector.broadcast %95 : f32 to vector<16x16xf32>
    %99 = arith.mulf %98, %97 : vector<16x16xf32>
    %100 = arith.addf %94, %99 : vector<16x16xf32>
    %c3_79 = arith.constant 3 : index
    %101 = memref.load %arg5[%c3_79] : memref<4xf32, #tpu.memory_space<smem>>
    %102 = vector.broadcast %101 : f32 to vector<16x16xf32>
    %103 = arith.addf %100, %102 : vector<16x16xf32>
    %c0_80 = arith.constant 0 : index
    %c0_81 = arith.constant 0 : index
    %104 = memref.load %arg6[%c0_80, %c0_81] : memref<4x4xf32, #tpu.memory_space<smem>>
    %c0_82 = arith.constant 0 : index
    %c0_83 = arith.constant 0 : index
    %c0_84 = arith.constant 0 : index
    %105 = vector.load %arg2[%c0_82, %c0_83, %c0_84] : memref<4x16x16xf32, #tpu.memory_space<vmem>>, vector<1x16x16xf32>
    %106 = vector.shape_cast %105 : vector<1x16x16xf32> to vector<16x16xf32>
    %107 = vector.broadcast %104 : f32 to vector<16x16xf32>
    %108 = arith.mulf %107, %106 : vector<16x16xf32>
    %c0_85 = arith.constant 0 : index
    %c1_86 = arith.constant 1 : index
    %109 = memref.load %arg6[%c0_85, %c1_86] : memref<4x4xf32, #tpu.memory_space<smem>>
    %c1_87 = arith.constant 1 : index
    %c0_88 = arith.constant 0 : index
    %c0_89 = arith.constant 0 : index
    %110 = vector.load %arg2[%c1_87, %c0_88, %c0_89] : memref<4x16x16xf32, #tpu.memory_space<vmem>>, vector<1x16x16xf32>
    %111 = vector.shape_cast %110 : vector<1x16x16xf32> to vector<16x16xf32>
    %112 = vector.broadcast %109 : f32 to vector<16x16xf32>
    %113 = arith.mulf %112, %111 : vector<16x16xf32>
    %114 = arith.addf %108, %113 : vector<16x16xf32>
    %c0_90 = arith.constant 0 : index
    %c2_91 = arith.constant 2 : index
    %115 = memref.load %arg6[%c0_90, %c2_91] : memref<4x4xf32, #tpu.memory_space<smem>>
    %c2_92 = arith.constant 2 : index
    %c0_93 = arith.constant 0 : index
    %c0_94 = arith.constant 0 : index
    %116 = vector.load %arg2[%c2_92, %c0_93, %c0_94] : memref<4x16x16xf32, #tpu.memory_space<vmem>>, vector<1x16x16xf32>
    %117 = vector.shape_cast %116 : vector<1x16x16xf32> to vector<16x16xf32>
    %118 = vector.broadcast %115 : f32 to vector<16x16xf32>
    %119 = arith.mulf %118, %117 : vector<16x16xf32>
    %120 = arith.addf %114, %119 : vector<16x16xf32>
    %c0_95 = arith.constant 0 : index
    %c3_96 = arith.constant 3 : index
    %121 = memref.load %arg6[%c0_95, %c3_96] : memref<4x4xf32, #tpu.memory_space<smem>>
    %c3_97 = arith.constant 3 : index
    %c0_98 = arith.constant 0 : index
    %c0_99 = arith.constant 0 : index
    %122 = vector.load %arg2[%c3_97, %c0_98, %c0_99] : memref<4x16x16xf32, #tpu.memory_space<vmem>>, vector<1x16x16xf32>
    %123 = vector.shape_cast %122 : vector<1x16x16xf32> to vector<16x16xf32>
    %124 = vector.broadcast %121 : f32 to vector<16x16xf32>
    %125 = arith.mulf %124, %123 : vector<16x16xf32>
    %126 = arith.addf %120, %125 : vector<16x16xf32>
    %c0_100 = arith.constant 0 : index
    %127 = memref.load %arg7[%c0_100] : memref<4xf32, #tpu.memory_space<smem>>
    %128 = vector.broadcast %127 : f32 to vector<16x16xf32>
    %129 = arith.addf %126, %128 : vector<16x16xf32>
    %c1_101 = arith.constant 1 : index
    %c0_102 = arith.constant 0 : index
    %130 = memref.load %arg6[%c1_101, %c0_102] : memref<4x4xf32, #tpu.memory_space<smem>>
    %c0_103 = arith.constant 0 : index
    %c0_104 = arith.constant 0 : index
    %c0_105 = arith.constant 0 : index
    %131 = vector.load %arg2[%c0_103, %c0_104, %c0_105] : memref<4x16x16xf32, #tpu.memory_space<vmem>>, vector<1x16x16xf32>
    %132 = vector.shape_cast %131 : vector<1x16x16xf32> to vector<16x16xf32>
    %133 = vector.broadcast %130 : f32 to vector<16x16xf32>
    %134 = arith.mulf %133, %132 : vector<16x16xf32>
    %c1_106 = arith.constant 1 : index
    %c1_107 = arith.constant 1 : index
    %135 = memref.load %arg6[%c1_106, %c1_107] : memref<4x4xf32, #tpu.memory_space<smem>>
    %c1_108 = arith.constant 1 : index
    %c0_109 = arith.constant 0 : index
    %c0_110 = arith.constant 0 : index
    %136 = vector.load %arg2[%c1_108, %c0_109, %c0_110] : memref<4x16x16xf32, #tpu.memory_space<vmem>>, vector<1x16x16xf32>
    %137 = vector.shape_cast %136 : vector<1x16x16xf32> to vector<16x16xf32>
    %138 = vector.broadcast %135 : f32 to vector<16x16xf32>
    %139 = arith.mulf %138, %137 : vector<16x16xf32>
    %140 = arith.addf %134, %139 : vector<16x16xf32>
    %c1_111 = arith.constant 1 : index
    %c2_112 = arith.constant 2 : index
    %141 = memref.load %arg6[%c1_111, %c2_112] : memref<4x4xf32, #tpu.memory_space<smem>>
    %c2_113 = arith.constant 2 : index
    %c0_114 = arith.constant 0 : index
    %c0_115 = arith.constant 0 : index
    %142 = vector.load %arg2[%c2_113, %c0_114, %c0_115] : memref<4x16x16xf32, #tpu.memory_space<vmem>>, vector<1x16x16xf32>
    %143 = vector.shape_cast %142 : vector<1x16x16xf32> to vector<16x16xf32>
    %144 = vector.broadcast %141 : f32 to vector<16x16xf32>
    %145 = arith.mulf %144, %143 : vector<16x16xf32>
    %146 = arith.addf %140, %145 : vector<16x16xf32>
    %c1_116 = arith.constant 1 : index
    %c3_117 = arith.constant 3 : index
    %147 = memref.load %arg6[%c1_116, %c3_117] : memref<4x4xf32, #tpu.memory_space<smem>>
    %c3_118 = arith.constant 3 : index
    %c0_119 = arith.constant 0 : index
    %c0_120 = arith.constant 0 : index
    %148 = vector.load %arg2[%c3_118, %c0_119, %c0_120] : memref<4x16x16xf32, #tpu.memory_space<vmem>>, vector<1x16x16xf32>
    %149 = vector.shape_cast %148 : vector<1x16x16xf32> to vector<16x16xf32>
    %150 = vector.broadcast %147 : f32 to vector<16x16xf32>
    %151 = arith.mulf %150, %149 : vector<16x16xf32>
    %152 = arith.addf %146, %151 : vector<16x16xf32>
    %c1_121 = arith.constant 1 : index
    %153 = memref.load %arg7[%c1_121] : memref<4xf32, #tpu.memory_space<smem>>
    %154 = vector.broadcast %153 : f32 to vector<16x16xf32>
    %155 = arith.addf %152, %154 : vector<16x16xf32>
    %c2_122 = arith.constant 2 : index
    %c0_123 = arith.constant 0 : index
    %156 = memref.load %arg6[%c2_122, %c0_123] : memref<4x4xf32, #tpu.memory_space<smem>>
    %c0_124 = arith.constant 0 : index
    %c0_125 = arith.constant 0 : index
    %c0_126 = arith.constant 0 : index
    %157 = vector.load %arg2[%c0_124, %c0_125, %c0_126] : memref<4x16x16xf32, #tpu.memory_space<vmem>>, vector<1x16x16xf32>
    %158 = vector.shape_cast %157 : vector<1x16x16xf32> to vector<16x16xf32>
    %159 = vector.broadcast %156 : f32 to vector<16x16xf32>
    %160 = arith.mulf %159, %158 : vector<16x16xf32>
    %c2_127 = arith.constant 2 : index
    %c1_128 = arith.constant 1 : index
    %161 = memref.load %arg6[%c2_127, %c1_128] : memref<4x4xf32, #tpu.memory_space<smem>>
    %c1_129 = arith.constant 1 : index
    %c0_130 = arith.constant 0 : index
    %c0_131 = arith.constant 0 : index
    %162 = vector.load %arg2[%c1_129, %c0_130, %c0_131] : memref<4x16x16xf32, #tpu.memory_space<vmem>>, vector<1x16x16xf32>
    %163 = vector.shape_cast %162 : vector<1x16x16xf32> to vector<16x16xf32>
    %164 = vector.broadcast %161 : f32 to vector<16x16xf32>
    %165 = arith.mulf %164, %163 : vector<16x16xf32>
    %166 = arith.addf %160, %165 : vector<16x16xf32>
    %c2_132 = arith.constant 2 : index
    %c2_133 = arith.constant 2 : index
    %167 = memref.load %arg6[%c2_132, %c2_133] : memref<4x4xf32, #tpu.memory_space<smem>>
    %c2_134 = arith.constant 2 : index
    %c0_135 = arith.constant 0 : index
    %c0_136 = arith.constant 0 : index
    %168 = vector.load %arg2[%c2_134, %c0_135, %c0_136] : memref<4x16x16xf32, #tpu.memory_space<vmem>>, vector<1x16x16xf32>
    %169 = vector.shape_cast %168 : vector<1x16x16xf32> to vector<16x16xf32>
    %170 = vector.broadcast %167 : f32 to vector<16x16xf32>
    %171 = arith.mulf %170, %169 : vector<16x16xf32>
    %172 = arith.addf %166, %171 : vector<16x16xf32>
    %c2_137 = arith.constant 2 : index
    %c3_138 = arith.constant 3 : index
    %173 = memref.load %arg6[%c2_137, %c3_138] : memref<4x4xf32, #tpu.memory_space<smem>>
    %c3_139 = arith.constant 3 : index
    %c0_140 = arith.constant 0 : index
    %c0_141 = arith.constant 0 : index
    %174 = vector.load %arg2[%c3_139, %c0_140, %c0_141] : memref<4x16x16xf32, #tpu.memory_space<vmem>>, vector<1x16x16xf32>
    %175 = vector.shape_cast %174 : vector<1x16x16xf32> to vector<16x16xf32>
    %176 = vector.broadcast %173 : f32 to vector<16x16xf32>
    %177 = arith.mulf %176, %175 : vector<16x16xf32>
    %178 = arith.addf %172, %177 : vector<16x16xf32>
    %c2_142 = arith.constant 2 : index
    %179 = memref.load %arg7[%c2_142] : memref<4xf32, #tpu.memory_space<smem>>
    %180 = vector.broadcast %179 : f32 to vector<16x16xf32>
    %181 = arith.addf %178, %180 : vector<16x16xf32>
    %c3_143 = arith.constant 3 : index
    %c0_144 = arith.constant 0 : index
    %182 = memref.load %arg6[%c3_143, %c0_144] : memref<4x4xf32, #tpu.memory_space<smem>>
    %c0_145 = arith.constant 0 : index
    %c0_146 = arith.constant 0 : index
    %c0_147 = arith.constant 0 : index
    %183 = vector.load %arg2[%c0_145, %c0_146, %c0_147] : memref<4x16x16xf32, #tpu.memory_space<vmem>>, vector<1x16x16xf32>
    %184 = vector.shape_cast %183 : vector<1x16x16xf32> to vector<16x16xf32>
    %185 = vector.broadcast %182 : f32 to vector<16x16xf32>
    %186 = arith.mulf %185, %184 : vector<16x16xf32>
    %c3_148 = arith.constant 3 : index
    %c1_149 = arith.constant 1 : index
    %187 = memref.load %arg6[%c3_148, %c1_149] : memref<4x4xf32, #tpu.memory_space<smem>>
    %c1_150 = arith.constant 1 : index
    %c0_151 = arith.constant 0 : index
    %c0_152 = arith.constant 0 : index
    %188 = vector.load %arg2[%c1_150, %c0_151, %c0_152] : memref<4x16x16xf32, #tpu.memory_space<vmem>>, vector<1x16x16xf32>
    %189 = vector.shape_cast %188 : vector<1x16x16xf32> to vector<16x16xf32>
    %190 = vector.broadcast %187 : f32 to vector<16x16xf32>
    %191 = arith.mulf %190, %189 : vector<16x16xf32>
    %192 = arith.addf %186, %191 : vector<16x16xf32>
    %c3_153 = arith.constant 3 : index
    %c2_154 = arith.constant 2 : index
    %193 = memref.load %arg6[%c3_153, %c2_154] : memref<4x4xf32, #tpu.memory_space<smem>>
    %c2_155 = arith.constant 2 : index
    %c0_156 = arith.constant 0 : index
    %c0_157 = arith.constant 0 : index
    %194 = vector.load %arg2[%c2_155, %c0_156, %c0_157] : memref<4x16x16xf32, #tpu.memory_space<vmem>>, vector<1x16x16xf32>
    %195 = vector.shape_cast %194 : vector<1x16x16xf32> to vector<16x16xf32>
    %196 = vector.broadcast %193 : f32 to vector<16x16xf32>
    %197 = arith.mulf %196, %195 : vector<16x16xf32>
    %198 = arith.addf %192, %197 : vector<16x16xf32>
    %c3_158 = arith.constant 3 : index
    %c3_159 = arith.constant 3 : index
    %199 = memref.load %arg6[%c3_158, %c3_159] : memref<4x4xf32, #tpu.memory_space<smem>>
    %c3_160 = arith.constant 3 : index
    %c0_161 = arith.constant 0 : index
    %c0_162 = arith.constant 0 : index
    %200 = vector.load %arg2[%c3_160, %c0_161, %c0_162] : memref<4x16x16xf32, #tpu.memory_space<vmem>>, vector<1x16x16xf32>
    %201 = vector.shape_cast %200 : vector<1x16x16xf32> to vector<16x16xf32>
    %202 = vector.broadcast %199 : f32 to vector<16x16xf32>
    %203 = arith.mulf %202, %201 : vector<16x16xf32>
    %204 = arith.addf %198, %203 : vector<16x16xf32>
    %c3_163 = arith.constant 3 : index
    %205 = memref.load %arg7[%c3_163] : memref<4xf32, #tpu.memory_space<smem>>
    %206 = vector.broadcast %205 : f32 to vector<16x16xf32>
    %207 = arith.addf %204, %206 : vector<16x16xf32>
    %c0_164 = arith.constant 0 : index
    %c0_165 = arith.constant 0 : index
    %208 = memref.load %arg8[%c0_164, %c0_165] : memref<4x4xf32, #tpu.memory_space<smem>>
    %c0_166 = arith.constant 0 : index
    %c0_167 = arith.constant 0 : index
    %c0_168 = arith.constant 0 : index
    %209 = vector.load %arg3[%c0_166, %c0_167, %c0_168] : memref<4x16x16xf32, #tpu.memory_space<vmem>>, vector<1x16x16xf32>
    %210 = vector.shape_cast %209 : vector<1x16x16xf32> to vector<16x16xf32>
    %211 = vector.broadcast %208 : f32 to vector<16x16xf32>
    %212 = arith.mulf %211, %210 : vector<16x16xf32>
    %c0_169 = arith.constant 0 : index
    %c1_170 = arith.constant 1 : index
    %213 = memref.load %arg8[%c0_169, %c1_170] : memref<4x4xf32, #tpu.memory_space<smem>>
    %c1_171 = arith.constant 1 : index
    %c0_172 = arith.constant 0 : index
    %c0_173 = arith.constant 0 : index
    %214 = vector.load %arg3[%c1_171, %c0_172, %c0_173] : memref<4x16x16xf32, #tpu.memory_space<vmem>>, vector<1x16x16xf32>
    %215 = vector.shape_cast %214 : vector<1x16x16xf32> to vector<16x16xf32>
    %216 = vector.broadcast %213 : f32 to vector<16x16xf32>
    %217 = arith.mulf %216, %215 : vector<16x16xf32>
    %218 = arith.addf %212, %217 : vector<16x16xf32>
    %c0_174 = arith.constant 0 : index
    %c2_175 = arith.constant 2 : index
    %219 = memref.load %arg8[%c0_174, %c2_175] : memref<4x4xf32, #tpu.memory_space<smem>>
    %c2_176 = arith.constant 2 : index
    %c0_177 = arith.constant 0 : index
    %c0_178 = arith.constant 0 : index
    %220 = vector.load %arg3[%c2_176, %c0_177, %c0_178] : memref<4x16x16xf32, #tpu.memory_space<vmem>>, vector<1x16x16xf32>
    %221 = vector.shape_cast %220 : vector<1x16x16xf32> to vector<16x16xf32>
    %222 = vector.broadcast %219 : f32 to vector<16x16xf32>
    %223 = arith.mulf %222, %221 : vector<16x16xf32>
    %224 = arith.addf %218, %223 : vector<16x16xf32>
    %c0_179 = arith.constant 0 : index
    %c3_180 = arith.constant 3 : index
    %225 = memref.load %arg8[%c0_179, %c3_180] : memref<4x4xf32, #tpu.memory_space<smem>>
    %c3_181 = arith.constant 3 : index
    %c0_182 = arith.constant 0 : index
    %c0_183 = arith.constant 0 : index
    %226 = vector.load %arg3[%c3_181, %c0_182, %c0_183] : memref<4x16x16xf32, #tpu.memory_space<vmem>>, vector<1x16x16xf32>
    %227 = vector.shape_cast %226 : vector<1x16x16xf32> to vector<16x16xf32>
    %228 = vector.broadcast %225 : f32 to vector<16x16xf32>
    %229 = arith.mulf %228, %227 : vector<16x16xf32>
    %230 = arith.addf %224, %229 : vector<16x16xf32>
    %c0_184 = arith.constant 0 : index
    %231 = memref.load %arg9[%c0_184] : memref<4xf32, #tpu.memory_space<smem>>
    %232 = vector.broadcast %231 : f32 to vector<16x16xf32>
    %233 = arith.addf %230, %232 : vector<16x16xf32>
    %c1_185 = arith.constant 1 : index
    %c0_186 = arith.constant 0 : index
    %234 = memref.load %arg8[%c1_185, %c0_186] : memref<4x4xf32, #tpu.memory_space<smem>>
    %c0_187 = arith.constant 0 : index
    %c0_188 = arith.constant 0 : index
    %c0_189 = arith.constant 0 : index
    %235 = vector.load %arg3[%c0_187, %c0_188, %c0_189] : memref<4x16x16xf32, #tpu.memory_space<vmem>>, vector<1x16x16xf32>
    %236 = vector.shape_cast %235 : vector<1x16x16xf32> to vector<16x16xf32>
    %237 = vector.broadcast %234 : f32 to vector<16x16xf32>
    %238 = arith.mulf %237, %236 : vector<16x16xf32>
    %c1_190 = arith.constant 1 : index
    %c1_191 = arith.constant 1 : index
    %239 = memref.load %arg8[%c1_190, %c1_191] : memref<4x4xf32, #tpu.memory_space<smem>>
    %c1_192 = arith.constant 1 : index
    %c0_193 = arith.constant 0 : index
    %c0_194 = arith.constant 0 : index
    %240 = vector.load %arg3[%c1_192, %c0_193, %c0_194] : memref<4x16x16xf32, #tpu.memory_space<vmem>>, vector<1x16x16xf32>
    %241 = vector.shape_cast %240 : vector<1x16x16xf32> to vector<16x16xf32>
    %242 = vector.broadcast %239 : f32 to vector<16x16xf32>
    %243 = arith.mulf %242, %241 : vector<16x16xf32>
    %244 = arith.addf %238, %243 : vector<16x16xf32>
    %c1_195 = arith.constant 1 : index
    %c2_196 = arith.constant 2 : index
    %245 = memref.load %arg8[%c1_195, %c2_196] : memref<4x4xf32, #tpu.memory_space<smem>>
    %c2_197 = arith.constant 2 : index
    %c0_198 = arith.constant 0 : index
    %c0_199 = arith.constant 0 : index
    %246 = vector.load %arg3[%c2_197, %c0_198, %c0_199] : memref<4x16x16xf32, #tpu.memory_space<vmem>>, vector<1x16x16xf32>
    %247 = vector.shape_cast %246 : vector<1x16x16xf32> to vector<16x16xf32>
    %248 = vector.broadcast %245 : f32 to vector<16x16xf32>
    %249 = arith.mulf %248, %247 : vector<16x16xf32>
    %250 = arith.addf %244, %249 : vector<16x16xf32>
    %c1_200 = arith.constant 1 : index
    %c3_201 = arith.constant 3 : index
    %251 = memref.load %arg8[%c1_200, %c3_201] : memref<4x4xf32, #tpu.memory_space<smem>>
    %c3_202 = arith.constant 3 : index
    %c0_203 = arith.constant 0 : index
    %c0_204 = arith.constant 0 : index
    %252 = vector.load %arg3[%c3_202, %c0_203, %c0_204] : memref<4x16x16xf32, #tpu.memory_space<vmem>>, vector<1x16x16xf32>
    %253 = vector.shape_cast %252 : vector<1x16x16xf32> to vector<16x16xf32>
    %254 = vector.broadcast %251 : f32 to vector<16x16xf32>
    %255 = arith.mulf %254, %253 : vector<16x16xf32>
    %256 = arith.addf %250, %255 : vector<16x16xf32>
    %c1_205 = arith.constant 1 : index
    %257 = memref.load %arg9[%c1_205] : memref<4xf32, #tpu.memory_space<smem>>
    %258 = vector.broadcast %257 : f32 to vector<16x16xf32>
    %259 = arith.addf %256, %258 : vector<16x16xf32>
    %c2_206 = arith.constant 2 : index
    %c0_207 = arith.constant 0 : index
    %260 = memref.load %arg8[%c2_206, %c0_207] : memref<4x4xf32, #tpu.memory_space<smem>>
    %c0_208 = arith.constant 0 : index
    %c0_209 = arith.constant 0 : index
    %c0_210 = arith.constant 0 : index
    %261 = vector.load %arg3[%c0_208, %c0_209, %c0_210] : memref<4x16x16xf32, #tpu.memory_space<vmem>>, vector<1x16x16xf32>
    %262 = vector.shape_cast %261 : vector<1x16x16xf32> to vector<16x16xf32>
    %263 = vector.broadcast %260 : f32 to vector<16x16xf32>
    %264 = arith.mulf %263, %262 : vector<16x16xf32>
    %c2_211 = arith.constant 2 : index
    %c1_212 = arith.constant 1 : index
    %265 = memref.load %arg8[%c2_211, %c1_212] : memref<4x4xf32, #tpu.memory_space<smem>>
    %c1_213 = arith.constant 1 : index
    %c0_214 = arith.constant 0 : index
    %c0_215 = arith.constant 0 : index
    %266 = vector.load %arg3[%c1_213, %c0_214, %c0_215] : memref<4x16x16xf32, #tpu.memory_space<vmem>>, vector<1x16x16xf32>
    %267 = vector.shape_cast %266 : vector<1x16x16xf32> to vector<16x16xf32>
    %268 = vector.broadcast %265 : f32 to vector<16x16xf32>
    %269 = arith.mulf %268, %267 : vector<16x16xf32>
    %270 = arith.addf %264, %269 : vector<16x16xf32>
    %c2_216 = arith.constant 2 : index
    %c2_217 = arith.constant 2 : index
    %271 = memref.load %arg8[%c2_216, %c2_217] : memref<4x4xf32, #tpu.memory_space<smem>>
    %c2_218 = arith.constant 2 : index
    %c0_219 = arith.constant 0 : index
    %c0_220 = arith.constant 0 : index
    %272 = vector.load %arg3[%c2_218, %c0_219, %c0_220] : memref<4x16x16xf32, #tpu.memory_space<vmem>>, vector<1x16x16xf32>
    %273 = vector.shape_cast %272 : vector<1x16x16xf32> to vector<16x16xf32>
    %274 = vector.broadcast %271 : f32 to vector<16x16xf32>
    %275 = arith.mulf %274, %273 : vector<16x16xf32>
    %276 = arith.addf %270, %275 : vector<16x16xf32>
    %c2_221 = arith.constant 2 : index
    %c3_222 = arith.constant 3 : index
    %277 = memref.load %arg8[%c2_221, %c3_222] : memref<4x4xf32, #tpu.memory_space<smem>>
    %c3_223 = arith.constant 3 : index
    %c0_224 = arith.constant 0 : index
    %c0_225 = arith.constant 0 : index
    %278 = vector.load %arg3[%c3_223, %c0_224, %c0_225] : memref<4x16x16xf32, #tpu.memory_space<vmem>>, vector<1x16x16xf32>
    %279 = vector.shape_cast %278 : vector<1x16x16xf32> to vector<16x16xf32>
    %280 = vector.broadcast %277 : f32 to vector<16x16xf32>
    %281 = arith.mulf %280, %279 : vector<16x16xf32>
    %282 = arith.addf %276, %281 : vector<16x16xf32>
    %c2_226 = arith.constant 2 : index
    %283 = memref.load %arg9[%c2_226] : memref<4xf32, #tpu.memory_space<smem>>
    %284 = vector.broadcast %283 : f32 to vector<16x16xf32>
    %285 = arith.addf %282, %284 : vector<16x16xf32>
    %c3_227 = arith.constant 3 : index
    %c0_228 = arith.constant 0 : index
    %286 = memref.load %arg8[%c3_227, %c0_228] : memref<4x4xf32, #tpu.memory_space<smem>>
    %c0_229 = arith.constant 0 : index
    %c0_230 = arith.constant 0 : index
    %c0_231 = arith.constant 0 : index
    %287 = vector.load %arg3[%c0_229, %c0_230, %c0_231] : memref<4x16x16xf32, #tpu.memory_space<vmem>>, vector<1x16x16xf32>
    %288 = vector.shape_cast %287 : vector<1x16x16xf32> to vector<16x16xf32>
    %289 = vector.broadcast %286 : f32 to vector<16x16xf32>
    %290 = arith.mulf %289, %288 : vector<16x16xf32>
    %c3_232 = arith.constant 3 : index
    %c1_233 = arith.constant 1 : index
    %291 = memref.load %arg8[%c3_232, %c1_233] : memref<4x4xf32, #tpu.memory_space<smem>>
    %c1_234 = arith.constant 1 : index
    %c0_235 = arith.constant 0 : index
    %c0_236 = arith.constant 0 : index
    %292 = vector.load %arg3[%c1_234, %c0_235, %c0_236] : memref<4x16x16xf32, #tpu.memory_space<vmem>>, vector<1x16x16xf32>
    %293 = vector.shape_cast %292 : vector<1x16x16xf32> to vector<16x16xf32>
    %294 = vector.broadcast %291 : f32 to vector<16x16xf32>
    %295 = arith.mulf %294, %293 : vector<16x16xf32>
    %296 = arith.addf %290, %295 : vector<16x16xf32>
    %c3_237 = arith.constant 3 : index
    %c2_238 = arith.constant 2 : index
    %297 = memref.load %arg8[%c3_237, %c2_238] : memref<4x4xf32, #tpu.memory_space<smem>>
    %c2_239 = arith.constant 2 : index
    %c0_240 = arith.constant 0 : index
    %c0_241 = arith.constant 0 : index
    %298 = vector.load %arg3[%c2_239, %c0_240, %c0_241] : memref<4x16x16xf32, #tpu.memory_space<vmem>>, vector<1x16x16xf32>
    %299 = vector.shape_cast %298 : vector<1x16x16xf32> to vector<16x16xf32>
    %300 = vector.broadcast %297 : f32 to vector<16x16xf32>
    %301 = arith.mulf %300, %299 : vector<16x16xf32>
    %302 = arith.addf %296, %301 : vector<16x16xf32>
    %c3_242 = arith.constant 3 : index
    %c3_243 = arith.constant 3 : index
    %303 = memref.load %arg8[%c3_242, %c3_243] : memref<4x4xf32, #tpu.memory_space<smem>>
    %c3_244 = arith.constant 3 : index
    %c0_245 = arith.constant 0 : index
    %c0_246 = arith.constant 0 : index
    %304 = vector.load %arg3[%c3_244, %c0_245, %c0_246] : memref<4x16x16xf32, #tpu.memory_space<vmem>>, vector<1x16x16xf32>
    %305 = vector.shape_cast %304 : vector<1x16x16xf32> to vector<16x16xf32>
    %306 = vector.broadcast %303 : f32 to vector<16x16xf32>
    %307 = arith.mulf %306, %305 : vector<16x16xf32>
    %308 = arith.addf %302, %307 : vector<16x16xf32>
    %c3_247 = arith.constant 3 : index
    %309 = memref.load %arg9[%c3_247] : memref<4xf32, #tpu.memory_space<smem>>
    %310 = vector.broadcast %309 : f32 to vector<16x16xf32>
    %311 = arith.addf %308, %310 : vector<16x16xf32>
    %cst = arith.constant 2.500000e-01 : f32
    %312 = vector.broadcast %cst : f32 to vector<16x16xf32>
    %313 = arith.mulf %25, %312 : vector<16x16xf32>
    %cst_248 = arith.constant dense<0.000000e+00> : vector<16x16xf32>
    %314 = tpu.matmul %313, %129, %cst_248 {dimension_numbers = #tpu.dot_dimension_numbers<[1], [1], [0], [0], [0, 0, 1, 0], [], []>} : vector<16x16xf32>, vector<16x16xf32>, vector<16x16xf32> -> vector<16x16xf32>
    %cst_249 = arith.constant dense<0xFF800000> : vector<16xf32>
    %315 = vector.multi_reduction <maximumf>, %314, %cst_249 [1] : vector<16x16xf32> to vector<16xf32>
    %316 = vector.shape_cast %315 : vector<16xf32> to vector<16x1xf32>
    %317 = vector.broadcast %316 : vector<16x1xf32> to vector<16x16xf32>
    %318 = arith.subf %314, %317 : vector<16x16xf32>
    %319 = math.exp %318 : vector<16x16xf32>
    %cst_250 = arith.constant dense<0.000000e+00> : vector<16xf32>
    %320 = vector.multi_reduction <add>, %319, %cst_250 [1] : vector<16x16xf32> to vector<16xf32>
    %321 = vector.shape_cast %320 : vector<16xf32> to vector<16x1xf32>
    %322 = tpu.reciprocal %321 : vector<16x1xf32> -> vector<16x1xf32>
    %323 = vector.broadcast %322 : vector<16x1xf32> to vector<16x16xf32>
    %324 = arith.mulf %319, %323 : vector<16x16xf32>
    %c0_251 = arith.constant 0 : index
    %c0_252 = arith.constant 0 : index
    %c0_253 = arith.constant 0 : index
    %325 = vector.load %arg13[%c0_251, %c0_252, %c0_253] : memref<4x16x16xf32, #tpu.memory_space<vmem>>, vector<1x16x16xf32>
    %326 = vector.shape_cast %325 : vector<1x16x16xf32> to vector<16x16xf32>
    %327 = vector.shape_cast %324 : vector<16x16xf32> to vector<1x16x16xf32>
    tpu.vector_store %arg13[%c0_251, %c0_252, %c0_253], %327 {strides = array<i32>} : memref<4x16x16xf32, #tpu.memory_space<vmem>>, vector<1x16x16xf32>,
    %cst_254 = arith.constant dense<0.000000e+00> : vector<16x16xf32>
    %328 = tpu.matmul %324, %233, %cst_254 {dimension_numbers = #tpu.dot_dimension_numbers<[1], [0], [0], [1], [0, 0, 1, 1], [], []>} : vector<16x16xf32>, vector<16x16xf32>, vector<16x16xf32> -> vector<16x16xf32>
    %cst_255 = arith.constant 2.500000e-01 : f32
    %329 = vector.broadcast %cst_255 : f32 to vector<16x16xf32>
    %330 = arith.mulf %51, %329 : vector<16x16xf32>
    %cst_256 = arith.constant dense<0.000000e+00> : vector<16x16xf32>
    %331 = tpu.matmul %330, %155, %cst_256 {dimension_numbers = #tpu.dot_dimension_numbers<[1], [1], [0], [0], [0, 0, 1, 0], [], []>} : vector<16x16xf32>, vector<16x16xf32>, vector<16x16xf32> -> vector<16x16xf32>
    %cst_257 = arith.constant dense<0xFF800000> : vector<16xf32>
    %332 = vector.multi_reduction <maximumf>, %331, %cst_257 [1] : vector<16x16xf32> to vector<16xf32>
    %333 = vector.shape_cast %332 : vector<16xf32> to vector<16x1xf32>
    %334 = vector.broadcast %333 : vector<16x1xf32> to vector<16x16xf32>
    %335 = arith.subf %331, %334 : vector<16x16xf32>
    %336 = math.exp %335 : vector<16x16xf32>
    %cst_258 = arith.constant dense<0.000000e+00> : vector<16xf32>
    %337 = vector.multi_reduction <add>, %336, %cst_258 [1] : vector<16x16xf32> to vector<16xf32>
    %338 = vector.shape_cast %337 : vector<16xf32> to vector<16x1xf32>
    %339 = tpu.reciprocal %338 : vector<16x1xf32> -> vector<16x1xf32>
    %340 = vector.broadcast %339 : vector<16x1xf32> to vector<16x16xf32>
    %341 = arith.mulf %336, %340 : vector<16x16xf32>
    %c1_259 = arith.constant 1 : index
    %c0_260 = arith.constant 0 : index
    %c0_261 = arith.constant 0 : index
    %342 = vector.load %arg13[%c1_259, %c0_260, %c0_261] : memref<4x16x16xf32, #tpu.memory_space<vmem>>, vector<1x16x16xf32>
    %343 = vector.shape_cast %342 : vector<1x16x16xf32> to vector<16x16xf32>
    %344 = vector.shape_cast %341 : vector<16x16xf32> to vector<1x16x16xf32>
    tpu.vector_store %arg13[%c1_259, %c0_260, %c0_261], %344 {strides = array<i32>} : memref<4x16x16xf32, #tpu.memory_space<vmem>>, vector<1x16x16xf32>,
    %cst_262 = arith.constant dense<0.000000e+00> : vector<16x16xf32>
    %345 = tpu.matmul %341, %259, %cst_262 {dimension_numbers = #tpu.dot_dimension_numbers<[1], [0], [0], [1], [0, 0, 1, 1], [], []>} : vector<16x16xf32>, vector<16x16xf32>, vector<16x16xf32> -> vector<16x16xf32>
    %cst_263 = arith.constant 2.500000e-01 : f32
    %346 = vector.broadcast %cst_263 : f32 to vector<16x16xf32>
    %347 = arith.mulf %77, %346 : vector<16x16xf32>
    %cst_264 = arith.constant dense<0.000000e+00> : vector<16x16xf32>
    %348 = tpu.matmul %347, %181, %cst_264 {dimension_numbers = #tpu.dot_dimension_numbers<[1], [1], [0], [0], [0, 0, 1, 0], [], []>} : vector<16x16xf32>, vector<16x16xf32>, vector<16x16xf32> -> vector<16x16xf32>
    %cst_265 = arith.constant dense<0xFF800000> : vector<16xf32>
    %349 = vector.multi_reduction <maximumf>, %348, %cst_265 [1] : vector<16x16xf32> to vector<16xf32>
    %350 = vector.shape_cast %349 : vector<16xf32> to vector<16x1xf32>
    %351 = vector.broadcast %350 : vector<16x1xf32> to vector<16x16xf32>
    %352 = arith.subf %348, %351 : vector<16x16xf32>
    %353 = math.exp %352 : vector<16x16xf32>
    %cst_266 = arith.constant dense<0.000000e+00> : vector<16xf32>
    %354 = vector.multi_reduction <add>, %353, %cst_266 [1] : vector<16x16xf32> to vector<16xf32>
    %355 = vector.shape_cast %354 : vector<16xf32> to vector<16x1xf32>
    %356 = tpu.reciprocal %355 : vector<16x1xf32> -> vector<16x1xf32>
    %357 = vector.broadcast %356 : vector<16x1xf32> to vector<16x16xf32>
    %358 = arith.mulf %353, %357 : vector<16x16xf32>
    %c2_267 = arith.constant 2 : index
    %c0_268 = arith.constant 0 : index
    %c0_269 = arith.constant 0 : index
    %359 = vector.load %arg13[%c2_267, %c0_268, %c0_269] : memref<4x16x16xf32, #tpu.memory_space<vmem>>, vector<1x16x16xf32>
    %360 = vector.shape_cast %359 : vector<1x16x16xf32> to vector<16x16xf32>
    %361 = vector.shape_cast %358 : vector<16x16xf32> to vector<1x16x16xf32>
    tpu.vector_store %arg13[%c2_267, %c0_268, %c0_269], %361 {strides = array<i32>} : memref<4x16x16xf32, #tpu.memory_space<vmem>>, vector<1x16x16xf32>,
    %cst_270 = arith.constant dense<0.000000e+00> : vector<16x16xf32>
    %362 = tpu.matmul %358, %285, %cst_270 {dimension_numbers = #tpu.dot_dimension_numbers<[1], [0], [0], [1], [0, 0, 1, 1], [], []>} : vector<16x16xf32>, vector<16x16xf32>, vector<16x16xf32> -> vector<16x16xf32>
    %cst_271 = arith.constant 2.500000e-01 : f32
    %363 = vector.broadcast %cst_271 : f32 to vector<16x16xf32>
    %364 = arith.mulf %103, %363 : vector<16x16xf32>
    %cst_272 = arith.constant dense<0.000000e+00> : vector<16x16xf32>
    %365 = tpu.matmul %364, %207, %cst_272 {dimension_numbers = #tpu.dot_dimension_numbers<[1], [1], [0], [0], [0, 0, 1, 0], [], []>} : vector<16x16xf32>, vector<16x16xf32>, vector<16x16xf32> -> vector<16x16xf32>
    %cst_273 = arith.constant dense<0xFF800000> : vector<16xf32>
    %366 = vector.multi_reduction <maximumf>, %365, %cst_273 [1] : vector<16x16xf32> to vector<16xf32>
    %367 = vector.shape_cast %366 : vector<16xf32> to vector<16x1xf32>
    %368 = vector.broadcast %367 : vector<16x1xf32> to vector<16x16xf32>
    %369 = arith.subf %365, %368 : vector<16x16xf32>
    %370 = math.exp %369 : vector<16x16xf32>
    %cst_274 = arith.constant dense<0.000000e+00> : vector<16xf32>
    %371 = vector.multi_reduction <add>, %370, %cst_274 [1] : vector<16x16xf32> to vector<16xf32>
    %372 = vector.shape_cast %371 : vector<16xf32> to vector<16x1xf32>
    %373 = tpu.reciprocal %372 : vector<16x1xf32> -> vector<16x1xf32>
    %374 = vector.broadcast %373 : vector<16x1xf32> to vector<16x16xf32>
    %375 = arith.mulf %370, %374 : vector<16x16xf32>
    %c3_275 = arith.constant 3 : index
    %c0_276 = arith.constant 0 : index
    %c0_277 = arith.constant 0 : index
    %376 = vector.load %arg13[%c3_275, %c0_276, %c0_277] : memref<4x16x16xf32, #tpu.memory_space<vmem>>, vector<1x16x16xf32>
    %377 = vector.shape_cast %376 : vector<1x16x16xf32> to vector<16x16xf32>
    %378 = vector.shape_cast %375 : vector<16x16xf32> to vector<1x16x16xf32>
    tpu.vector_store %arg13[%c3_275, %c0_276, %c0_277], %378 {strides = array<i32>} : memref<4x16x16xf32, #tpu.memory_space<vmem>>, vector<1x16x16xf32>,
    %cst_278 = arith.constant dense<0.000000e+00> : vector<16x16xf32>
    %379 = tpu.matmul %375, %311, %cst_278 {dimension_numbers = #tpu.dot_dimension_numbers<[1], [0], [0], [1], [0, 0, 1, 1], [], []>} : vector<16x16xf32>, vector<16x16xf32>, vector<16x16xf32> -> vector<16x16xf32>
    %c0_279 = arith.constant 0 : index
    %c0_280 = arith.constant 0 : index
    %380 = memref.load %arg10[%c0_279, %c0_280] : memref<4x4xf32, #tpu.memory_space<smem>>
    %381 = vector.broadcast %380 : f32 to vector<16x16xf32>
    %382 = arith.mulf %381, %328 : vector<16x16xf32>
    %c0_281 = arith.constant 0 : index
    %c1_282 = arith.constant 1 : index
    %383 = memref.load %arg10[%c0_281, %c1_282] : memref<4x4xf32, #tpu.memory_space<smem>>
    %384 = vector.broadcast %383 : f32 to vector<16x16xf32>
    %385 = arith.mulf %384, %345 : vector<16x16xf32>
    %386 = arith.addf %382, %385 : vector<16x16xf32>
    %c0_283 = arith.constant 0 : index
    %c2_284 = arith.constant 2 : index
    %387 = memref.load %arg10[%c0_283, %c2_284] : memref<4x4xf32, #tpu.memory_space<smem>>
    %388 = vector.broadcast %387 : f32 to vector<16x16xf32>
    %389 = arith.mulf %388, %362 : vector<16x16xf32>
    %390 = arith.addf %386, %389 : vector<16x16xf32>
    %c0_285 = arith.constant 0 : index
    %c3_286 = arith.constant 3 : index
    %391 = memref.load %arg10[%c0_285, %c3_286] : memref<4x4xf32, #tpu.memory_space<smem>>
    %392 = vector.broadcast %391 : f32 to vector<16x16xf32>
    %393 = arith.mulf %392, %379 : vector<16x16xf32>
    %394 = arith.addf %390, %393 : vector<16x16xf32>
    %c0_287 = arith.constant 0 : index
    %395 = memref.load %arg11[%c0_287] : memref<4xf32, #tpu.memory_space<smem>>
    %396 = vector.broadcast %395 : f32 to vector<16x16xf32>
    %397 = arith.addf %394, %396 : vector<16x16xf32>
    %c0_288 = arith.constant 0 : index
    %c0_289 = arith.constant 0 : index
    %c0_290 = arith.constant 0 : index
    %398 = vector.load %arg12[%c0_288, %c0_289, %c0_290] : memref<4x16x16xf32, #tpu.memory_space<vmem>>, vector<1x16x16xf32>
    %399 = vector.shape_cast %398 : vector<1x16x16xf32> to vector<16x16xf32>
    %400 = vector.shape_cast %397 : vector<16x16xf32> to vector<1x16x16xf32>
    tpu.vector_store %arg12[%c0_288, %c0_289, %c0_290], %400 {strides = array<i32>} : memref<4x16x16xf32, #tpu.memory_space<vmem>>, vector<1x16x16xf32>,
    %c1_291 = arith.constant 1 : index
    %c0_292 = arith.constant 0 : index
    %401 = memref.load %arg10[%c1_291, %c0_292] : memref<4x4xf32, #tpu.memory_space<smem>>
    %402 = vector.broadcast %401 : f32 to vector<16x16xf32>
    %403 = arith.mulf %402, %328 : vector<16x16xf32>
    %c1_293 = arith.constant 1 : index
    %c1_294 = arith.constant 1 : index
    %404 = memref.load %arg10[%c1_293, %c1_294] : memref<4x4xf32, #tpu.memory_space<smem>>
    %405 = vector.broadcast %404 : f32 to vector<16x16xf32>
    %406 = arith.mulf %405, %345 : vector<16x16xf32>
    %407 = arith.addf %403, %406 : vector<16x16xf32>
    %c1_295 = arith.constant 1 : index
    %c2_296 = arith.constant 2 : index
    %408 = memref.load %arg10[%c1_295, %c2_296] : memref<4x4xf32, #tpu.memory_space<smem>>
    %409 = vector.broadcast %408 : f32 to vector<16x16xf32>
    %410 = arith.mulf %409, %362 : vector<16x16xf32>
    %411 = arith.addf %407, %410 : vector<16x16xf32>
    %c1_297 = arith.constant 1 : index
    %c3_298 = arith.constant 3 : index
    %412 = memref.load %arg10[%c1_297, %c3_298] : memref<4x4xf32, #tpu.memory_space<smem>>
    %413 = vector.broadcast %412 : f32 to vector<16x16xf32>
    %414 = arith.mulf %413, %379 : vector<16x16xf32>
    %415 = arith.addf %411, %414 : vector<16x16xf32>
    %c1_299 = arith.constant 1 : index
    %416 = memref.load %arg11[%c1_299] : memref<4xf32, #tpu.memory_space<smem>>
    %417 = vector.broadcast %416 : f32 to vector<16x16xf32>
    %418 = arith.addf %415, %417 : vector<16x16xf32>
    %c1_300 = arith.constant 1 : index
    %c0_301 = arith.constant 0 : index
    %c0_302 = arith.constant 0 : index
    %419 = vector.load %arg12[%c1_300, %c0_301, %c0_302] : memref<4x16x16xf32, #tpu.memory_space<vmem>>, vector<1x16x16xf32>
    %420 = vector.shape_cast %419 : vector<1x16x16xf32> to vector<16x16xf32>
    %421 = vector.shape_cast %418 : vector<16x16xf32> to vector<1x16x16xf32>
    tpu.vector_store %arg12[%c1_300, %c0_301, %c0_302], %421 {strides = array<i32>} : memref<4x16x16xf32, #tpu.memory_space<vmem>>, vector<1x16x16xf32>,
    %c2_303 = arith.constant 2 : index
    %c0_304 = arith.constant 0 : index
    %422 = memref.load %arg10[%c2_303, %c0_304] : memref<4x4xf32, #tpu.memory_space<smem>>
    %423 = vector.broadcast %422 : f32 to vector<16x16xf32>
    %424 = arith.mulf %423, %328 : vector<16x16xf32>
    %c2_305 = arith.constant 2 : index
    %c1_306 = arith.constant 1 : index
    %425 = memref.load %arg10[%c2_305, %c1_306] : memref<4x4xf32, #tpu.memory_space<smem>>
    %426 = vector.broadcast %425 : f32 to vector<16x16xf32>
    %427 = arith.mulf %426, %345 : vector<16x16xf32>
    %428 = arith.addf %424, %427 : vector<16x16xf32>
    %c2_307 = arith.constant 2 : index
    %c2_308 = arith.constant 2 : index
    %429 = memref.load %arg10[%c2_307, %c2_308] : memref<4x4xf32, #tpu.memory_space<smem>>
    %430 = vector.broadcast %429 : f32 to vector<16x16xf32>
    %431 = arith.mulf %430, %362 : vector<16x16xf32>
    %432 = arith.addf %428, %431 : vector<16x16xf32>
    %c2_309 = arith.constant 2 : index
    %c3_310 = arith.constant 3 : index
    %433 = memref.load %arg10[%c2_309, %c3_310] : memref<4x4xf32, #tpu.memory_space<smem>>
    %434 = vector.broadcast %433 : f32 to vector<16x16xf32>
    %435 = arith.mulf %434, %379 : vector<16x16xf32>
    %436 = arith.addf %432, %435 : vector<16x16xf32>
    %c2_311 = arith.constant 2 : index
    %437 = memref.load %arg11[%c2_311] : memref<4xf32, #tpu.memory_space<smem>>
    %438 = vector.broadcast %437 : f32 to vector<16x16xf32>
    %439 = arith.addf %436, %438 : vector<16x16xf32>
    %c2_312 = arith.constant 2 : index
    %c0_313 = arith.constant 0 : index
    %c0_314 = arith.constant 0 : index
    %440 = vector.load %arg12[%c2_312, %c0_313, %c0_314] : memref<4x16x16xf32, #tpu.memory_space<vmem>>, vector<1x16x16xf32>
    %441 = vector.shape_cast %440 : vector<1x16x16xf32> to vector<16x16xf32>
    %442 = vector.shape_cast %439 : vector<16x16xf32> to vector<1x16x16xf32>
    tpu.vector_store %arg12[%c2_312, %c0_313, %c0_314], %442 {strides = array<i32>} : memref<4x16x16xf32, #tpu.memory_space<vmem>>, vector<1x16x16xf32>,
    %c3_315 = arith.constant 3 : index
    %c0_316 = arith.constant 0 : index
    %443 = memref.load %arg10[%c3_315, %c0_316] : memref<4x4xf32, #tpu.memory_space<smem>>
    %444 = vector.broadcast %443 : f32 to vector<16x16xf32>
    %445 = arith.mulf %444, %328 : vector<16x16xf32>
    %c3_317 = arith.constant 3 : index
    %c1_318 = arith.constant 1 : index
    %446 = memref.load %arg10[%c3_317, %c1_318] : memref<4x4xf32, #tpu.memory_space<smem>>
    %447 = vector.broadcast %446 : f32 to vector<16x16xf32>
    %448 = arith.mulf %447, %345 : vector<16x16xf32>
    %449 = arith.addf %445, %448 : vector<16x16xf32>
    %c3_319 = arith.constant 3 : index
    %c2_320 = arith.constant 2 : index
    %450 = memref.load %arg10[%c3_319, %c2_320] : memref<4x4xf32, #tpu.memory_space<smem>>
    %451 = vector.broadcast %450 : f32 to vector<16x16xf32>
    %452 = arith.mulf %451, %362 : vector<16x16xf32>
    %453 = arith.addf %449, %452 : vector<16x16xf32>
    %c3_321 = arith.constant 3 : index
    %c3_322 = arith.constant 3 : index
    %454 = memref.load %arg10[%c3_321, %c3_322] : memref<4x4xf32, #tpu.memory_space<smem>>
    %455 = vector.broadcast %454 : f32 to vector<16x16xf32>
    %456 = arith.mulf %455, %379 : vector<16x16xf32>
    %457 = arith.addf %453, %456 : vector<16x16xf32>
    %c3_323 = arith.constant 3 : index
    %458 = memref.load %arg11[%c3_323] : memref<4xf32, #tpu.memory_space<smem>>
    %459 = vector.broadcast %458 : f32 to vector<16x16xf32>
    %460 = arith.addf %457, %459 : vector<16x16xf32>
    %c3_324 = arith.constant 3 : index
    %c0_325 = arith.constant 0 : index
    %c0_326 = arith.constant 0 : index
    %461 = vector.load %arg12[%c3_324, %c0_325, %c0_326] : memref<4x16x16xf32, #tpu.memory_space<vmem>>, vector<1x16x16xf32>
    %462 = vector.shape_cast %461 : vector<1x16x16xf32> to vector<16x16xf32>
    %463 = vector.shape_cast %460 : vector<16x16xf32> to vector<1x16x16xf32>
    tpu.vector_store %arg12[%c3_324, %c0_325, %c0_326], %463 {strides = array<i32>} : memref<4x16x16xf32, #tpu.memory_space<vmem>>, vector<1x16x16xf32>,
    return
  }
  func.func @transform_0(%arg0: i32) -> (i32, i32, i32) {
    %c0_i32 = arith.constant 0 : i32
    %c0_i32_0 = arith.constant 0 : i32
    %c0_i32_1 = arith.constant 0 : i32
    return %arg0, %c0_i32, %c0_i32_0 : i32, i32, i32
  }
  func.func @transform_1(%arg0: i32) -> (i32, i32, i32) {
    %c0_i32 = arith.constant 0 : i32
    %c0_i32_0 = arith.constant 0 : i32
    %c0_i32_1 = arith.constant 0 : i32
    return %arg0, %c0_i32, %c0_i32_0 : i32, i32, i32
  }
  func.func @transform_2(%arg0: i32) -> (i32, i32, i32) {
    %c0_i32 = arith.constant 0 : i32
    %c0_i32_0 = arith.constant 0 : i32
    %c0_i32_1 = arith.constant 0 : i32
    return %arg0, %c0_i32, %c0_i32_0 : i32, i32, i32
  }
  func.func @transform_3(%arg0: i32) -> (i32, i32) {
    %c0_i32 = arith.constant 0 : i32
    %c0_i32_0 = arith.constant 0 : i32
    %c0_i32_1 = arith.constant 0 : i32
    return %c0_i32, %c0_i32_0 : i32, i32
  }
  func.func @transform_4(%arg0: i32) -> i32 {
    %c0_i32 = arith.constant 0 : i32
    %c0_i32_0 = arith.constant 0 : i32
    return %c0_i32 : i32
  }
  func.func @transform_5(%arg0: i32) -> (i32, i32) {
    %c0_i32 = arith.constant 0 : i32
    %c0_i32_0 = arith.constant 0 : i32
    %c0_i32_1 = arith.constant 0 : i32
    return %c0_i32, %c0_i32_0 : i32, i32
  }
  func.func @transform_6(%arg0: i32) -> i32 {
    %c0_i32 = arith.constant 0 : i32
    %c0_i32_0 = arith.constant 0 : i32
    return %c0_i32 : i32
  }
  func.func @transform_7(%arg0: i32) -> (i32, i32) {
    %c0_i32 = arith.constant 0 : i32
    %c0_i32_0 = arith.constant 0 : i32
    %c0_i32_1 = arith.constant 0 : i32
    return %c0_i32, %c0_i32_0 : i32, i32
  }
  func.func @transform_8(%arg0: i32) -> i32 {
    %c0_i32 = arith.constant 0 : i32
    %c0_i32_0 = arith.constant 0 : i32
    return %c0_i32 : i32
  }
  func.func @transform_9(%arg0: i32) -> (i32, i32) {
    %c0_i32 = arith.constant 0 : i32
    %c0_i32_0 = arith.constant 0 : i32
    %c0_i32_1 = arith.constant 0 : i32
    return %c0_i32, %c0_i32_0 : i32, i32
  }
  func.func @transform_10(%arg0: i32) -> i32 {
    %c0_i32 = arith.constant 0 : i32
    %c0_i32_0 = arith.constant 0 : i32
    return %c0_i32 : i32
  }
  func.func @transform_11(%arg0: i32) -> (i32, i32, i32) {
    %c0_i32 = arith.constant 0 : i32
    %c0_i32_0 = arith.constant 0 : i32
    %c0_i32_1 = arith.constant 0 : i32
    return %arg0, %c0_i32, %c0_i32_0 : i32, i32, i32
  }
  func.func @transform_12(%arg0: i32) -> (i32, i32, i32) {
    %c0_i32 = arith.constant 0 : i32
    %c0_i32_0 = arith.constant 0 : i32
    %c0_i32_1 = arith.constant 0 : i32
    return %arg0, %c0_i32, %c0_i32_0 : i32, i32, i32
  }
}

</mosaic_0001>

<bundles_post_ra>
// kernel: tpu_custom_call.1
= control target key start
LH: loop header
LB: loop body
LE: loop exit
PB: predicated region body
PF: predicated region fallthrough
CT: control target
= control target key end

     0   :  { %s3410_s0 = inlined_call_operand.hbm [shape: f32[8,16,16], index: 0, kind: input, shape index: {}]   ;;  %s3411_s1 = inlined_call_operand.hbm [shape: f32[8,16,16], index: 1, kind: input, shape index: {}]   ;;  %s3412_s2 = inlined_call_operand.hbm [shape: f32[8,16,16], index: 2, kind: input, shape index: {}]   ;;  %s3413_s3 = inlined_call_operand.hbm [shape: f32[4,4], index: 3, kind: input, shape index: {}]   ;;  %s3414_s4 = inlined_call_operand.hbm [shape: f32[4], index: 4, kind: input, shape index: {}]   ;;  %s3415_s5 = inlined_call_operand.vmem [shape: f32[4,4], index: 5, kind: input, shape index: {}]   ;;  %s3416_s6 = inlined_call_operand.hbm [shape: f32[4], index: 6, kind: input, shape index: {}]   ;;  %s3417_s7 = inlined_call_operand.hbm [shape: f32[4,4], index: 7, kind: input, shape index: {}]   ;;  %s3418_s8 = inlined_call_operand.hbm [shape: f32[4], index: 8, kind: input, shape index: {}]   ;;  %s3419_s9 = inlined_call_operand.vmem [shape: f32[4,4], index: 9, kind: input, shape index: {}]   ;;  %s3420_s10 = inlined_call_operand.vmem [shape: f32[4], index: 10, kind: input, shape index: {}]   ;;  %s3421_s11 = inlined_call_operand.hbm [shape: f32[8,16,16], index: 11, kind: output, shape index: {0}]   ;;  %s3422_s12 = inlined_call_operand.hbm [shape: f32[8,16,16], index: 12, kind: output, shape index: {1}]  }
   0x1   :  { %3441 = sst [smem:[#allocation40_spill]] %s3410_s0 }
   0x2   :  { %3442 = sst [smem:[#allocation41_spill]] %s3411_s1 }
   0x3   :  { %3443 = sst [smem:[#allocation42_spill]] %s3414_s4 }
   0x4   :  { %3444 = sst [smem:[#allocation43_spill]] %s3417_s7 }
   0x5   :  { %3445 = sst [smem:[#allocation44_spill]] %s3419_s9 }
   0x6   :  { %3446 = sst [smem:[#allocation45_spill]] %s3421_s11 }
   0x7   :  { %3447 = sst [smem:[#allocation46_spill]] %s3422_s12 }
   0x8   :  { %18 = vsyncpa [#allocation3], 0 }
   0x9   :  { %20 = vsyncpa [#allocation3 + $0x1], 0 }
   0xa   :  { %21 = vsyncpa [#allocation8], 0 }
   0xb   :  { %23 = vsyncpa [#allocation8 + $0x1], 0 }
   0xc   :  { %24 = vsyncpa [#allocation5], 0 }
   0xd   :  { %25 = vsyncpa [#allocation12], 0 }
   0xe   :  { %26 = vsyncpa [#allocation6], 0 }
   0xf   :  { %27 = vsyncpa [#allocation16], 0 }
  0x10   :  { %28 = vsyncpa [#allocation19], 0 }
  0x11   :  { %29 = vsyncpa [#allocation4], 0 }
  0x12   :  { %31 = vsyncpa [#allocation4 + $0x1], 0 }
  0x13   :  { %32 = vsyncpa [#allocation23], 0 }
  0x14   :  { %34 = vsyncpa [#allocation23 + $0x1], 0  ;;  %s2610_s21 = smov 0   ;;  %s2612_s22 = smov 0  }
  0x15   :  { %s2614_s23 = smov 0   ;;  %s2616_s24 = smov 0  }
  0x16 LB: > { %3448 = sst [smem:[#allocation34_spill]] %s2519_s21  ;;  %s2634_s28 = sadd.s32 4294967295, %s2531_s24   ;;  %s2531_s24 = sphi %s2616_s24, %s3490_s24   ;;  %s2527_s23 = sphi %s2614_s23, %s3494_s23   ;;  %s2523_s22 = sphi %s2612_s22, %s3493_s22   ;;  %s2519_s21 = sphi %s2610_s21, %s3492_s21  }
  0x17   : > { %3449 = sst [smem:[#allocation35_spill]] %s2531_s24  ;;  %p1835_p0 = scmp.ge.s32.totalorder %s2531_s24, 1 }
  0x18   : > { %s3450_s4 = sld [smem:[#allocation42_spill]]  ;;  %p3433_p1 = scmp.eq.s32.totalorder %s2634_s28, 0 }
  0x19   : > { %p343_p2 = scmp.lt.s32.totalorder %s2531_s24, 3  ;;  %s3452_s7 = sld [smem:[#allocation43_spill]] }
  0x1a   : > { %s3453_s9 = sld [smem:[#allocation44_spill]]  ;;  %s2533_s19 = smov [#allocation11]  }
  0x1b   : > { %p2639_p3 = pnand %p1835_p0, %p343_p2  ;;  %s2534_s20 = smov [#allocation15]  }
  0x1c   : > { %s2535_s25 = smov [#allocation18]   ;;  %s1834_s26 = sadd.s32 4294967294, %s2531_s24  }
  0x1d   : > { %p2059_p5 = pneg %p2639_p3  ;;  %s2666_s30 = sadd.s32 1, %s2531_s24  }
  0x1e   : > { %s365_s27 = sshll.u32 %s3450_s4, 4  ;;  %3455 = sst [smem:[#allocation36_spill]] %s2666_s30  ;;  %s366_s27 = int_to_ptr.hbm [resolvable:$true] %s365_s27 }
  0x1f   : > { %s395_s14 = sshll.u32 %s3452_s7, 4  ;;  %p2654_p6 = pnand %p2059_p5, %p3433_p1  ;;  %s396_s14 = int_to_ptr.hbm [resolvable:$true] %s395_s14 }
  0x20   : > { %s415_s17 = sshll.u32 %s3453_s9, 4  ;;  %s47_s13 = sadd.s32 1, %s2527_s23  ;;  %s416_s17 = int_to_ptr.vmem [resolvable:$true] %s415_s17 }
  0x21   : > { %2065 = dma.hbm_to_smem (!%p2654_p6), %s366_s27, 16, %s2533_s19, [#allocation12]  }
  0x22   : > { %2074 = dma.hbm_to_smem (!%p2654_p6), %s396_s14, 64, %s2534_s20, [#allocation16]  }
  0x23   : > { %2080 = dma.vmem_to_smem (!%p2654_p6), %s416_s17, 64, %s2535_s25, [#allocation19]  }
  0x24   : > { %s44_s15 = ssub.s32 %s2531_s24, %s2666_s30  ;;  %p54_p7 = scmp.ne.s32.totalorder %s2527_s23, %s2523_s22 }
  0x25   : > { %p45_p8 = scmp.eq.s32.totalorder %s44_s15, 0  ;;  %p55_p9 = scmp.eq.s32.totalorder %s2531_s24, 0 }
  0x26   : > { %p60_p10 = scmp.ne.s32.totalorder %s2523_s22, %s2519_s21  ;;  %p304_p11 = scmp.eq.s32.totalorder %s2634_s28, 1 }
  0x27   : > { %s2678_s27 = scalar_select %p45_p8, %s2527_s23, %s47_s13  }
  0x28   : > { %p56_p12 = por %p55_p9, %p54_p7  ;;  %p2682_p13 = por %p3433_p1, %p60_p10 }
  0x29   : > { %3456 = sst [smem:[#allocation37_spill]] %s2678_s27  ;;  %p2686_p0 = por %p304_p11, %p54_p7 }
  0x2a   : > { %p310_p2 = scmp.eq.s32.totalorder %s1834_s26, 1  ;;  %p2109_p5 = scmp.lt.s32.totalorder %s2531_s24, 2 }
  0x2b   : > { %s3458_s16 = scalar_select %p2686_p0, 1, 0 }
  0x2c   : > { %s3425_s17 = sand.u32 1, %s2527_s23   ;;  %p2692_p4 = por %p310_p2, %p60_p10 }
  0x2d   : > { %3459 = sst [smem:[#allocation38_spill]] %s3458_s16  ;;  %s2698_s20 = sshll.u32 %s3425_s17, 6 }
  0x2e   : > { %s3460_s19 = scalar_select %p2692_p4, 1, 0 }
  0x2f   : > { %s2701_s25 = sshll.u32 %s2531_s24, 6  ;;  %p2703_p8 = pnand %p2109_p5, %p56_p12 }
  0x30   : > { %3461 = sst [smem:[#allocation39_spill]] %s3460_s19  ;;  %s459_s26 = sand.u32 1, %s2531_s24  }
  0x31   : > { %s3463_s1 = sld [smem:[#allocation41_spill]]  ;;  %s463_s9 = scalar_lea.vmem [#allocation7], %s2698_s20 }
  0x32   : > { %s472_s27 = sshll.u32 %s463_s9, 4  ;;  %s355_s21 = sshll.u32 %s3413_s3, 4  ;;  %s473_s27 = int_to_ptr.vmem [resolvable:$true] %s472_s27  ;;  %s356_s21 = int_to_ptr.hbm [resolvable:$true] %s355_s21 }
  0x33   : > { %s2716_s11 = scalar_lea.sflag [#allocation8], %s459_s26  ;;  %p2244_p9 = pneg %p2703_p8 }
  0x37   : > { %s469_s7 = scalar_lea.hbm %s3463_s1, %s2701_s25  ;;  %s2247_s9 = scalar_lea.hbm %s3463_s1, 128 }
  0x38   : > { %s470_s30 = sshll.u32 %s469_s7, 4  ;;  %s471_s30 = int_to_ptr.hbm [resolvable:$true] %s470_s30 }
  0x39   : > { %s2240_s12 = sshra.s32 %s471_s30, 4  ;;  %s2241_s12 = int_to_ptr.hbm [resolvable:$true] %s2240_s12 }
  0x3a   : > { %s2242_s16 = scalar_lea.hbm %s2241_s12, 64  ;;  %p2248_p12 = scmp.lt.s32.totalorder %s2241_s12, %s3463_s1 }
  0x3b   : > { %p2243_p7 = scmp.ne.s32.totalorder %s2241_s12, %s2242_s16  ;;  %p2249_p2 = scmp.lt.s32.totalorder %s2247_s9, %s2242_s16 }
  0x3d   : > { %p2245_p10 = pnand %p2244_p9, %p2243_p7  ;;  %p2250_p5 = por %p2249_p2, %p2248_p12 }
  0x3f   : > { %p2246_p11 = pneg %p2245_p10 }
  0x41   : > { %p2251_p1 = pnand %p2250_p5, %p2246_p11 }
  0x43   : > { %2254 = shalt.err (!%p2251_p1)
}
  0x44   : > { %s3434_s17 = smov 128   ;;  %s3436_s19 = smov 8  }
  0x45   : > { %2090 = dma.hbm_to_vmem [thread:$0]  (!%p2703_p8), %s471_s30, 1024, %s473_s27, %s2716_s11, %s3434_s17, %s3434_s17, %s3436_s19  }
  0x46   : > { %s2538_s24 = smov [#allocation10]   ;;  %s375_s26 = sshll.u32 %s3415_s5, 4  ;;  %s376_s26 = int_to_ptr.vmem [resolvable:$true] %s375_s26 }
  0x47   : > { %2062 = dma.hbm_to_smem (!%p2654_p6), %s356_s21, 64, %s2538_s24, [#allocation5]  }
  0x48   : > { %s385_s9 = sshll.u32 %s3416_s6, 4  ;;  %s2539_s15 = smov [#allocation13]   ;;  %s386_s9 = int_to_ptr.hbm [resolvable:$true] %s385_s9 }
  0x49   : > { %2068 = dma.vmem_to_smem (!%p2654_p6), %s376_s26, 64, %s2539_s15, [#allocation6]  }
  0x4a   : > { %s2540_s30 = smov [#allocation14]   ;;  %s405_s24 = sshll.u32 %s3418_s8, 4  ;;  %s406_s24 = int_to_ptr.hbm [resolvable:$true] %s405_s24 }
  0x4b   : > { %2071 = dma.hbm_to_smem (!%p2654_p6), %s386_s9, 16, %s2540_s30, [#allocation12]  }
  0x4c   : > { %s425_s17 = sshll.u32 %s3420_s10, 4  ;;  %s2541_s4 = smov [#allocation17]   ;;  %s426_s17 = int_to_ptr.vmem [resolvable:$true] %s425_s17 }
  0x4d   : > { %2077 = dma.hbm_to_smem (!%p2654_p6), %s406_s24, 16, %s2541_s4, [#allocation16]  }
  0x4e   : > { %s2542_s26 = smov [#allocation20]   ;;  %s3464_s0 = sld [smem:[#allocation40_spill]] }
  0x4f   : > { %2083 = dma.vmem_to_smem (!%p2654_p6), %s426_s17, 16, %s2542_s26, [#allocation19]  }
  0x50   : > { %s440_s30 = scalar_lea.vmem [#allocation2], %s2698_s20  ;;  %s3465_s19 = sand.u32 1, %s2527_s23  }
  0x51   : > { %s449_s21 = sshll.u32 %s440_s30, 4  ;;  %s437_s12 = scalar_lea.sflag [#allocation3], %s3465_s19  ;;  %s450_s21 = int_to_ptr.vmem [resolvable:$true] %s449_s21 }
  0x54   : > { %s446_s9 = scalar_lea.hbm %s3464_s0, %s2701_s25  ;;  %s2352_s24 = scalar_lea.hbm %s3464_s0, 128 }
  0x55   : > { %s447_s27 = sshll.u32 %s446_s9, 4  ;;  %s448_s27 = int_to_ptr.hbm [resolvable:$true] %s447_s27 }
  0x56   : > { %s2345_s16 = sshra.s32 %s448_s27, 4  ;;  %s2346_s16 = int_to_ptr.hbm [resolvable:$true] %s2345_s16 }
  0x57   : > { %s2347_s1 = scalar_lea.hbm %s2346_s16, 64  ;;  %p2353_p6 = scmp.lt.s32.totalorder %s2346_s16, %s3464_s0 }
  0x58   : > { %p2348_p1 = scmp.ne.s32.totalorder %s2346_s16, %s2347_s1  ;;  %p2354_p11 = scmp.lt.s32.totalorder %s2352_s24, %s2347_s1 }
  0x5a   : > { %p2350_p7 = pnand %p2348_p1, %p2244_p9  ;;  %p2355_p12 = por %p2354_p11, %p2353_p6 }
  0x5c   : > { %p2351_p10 = pneg %p2350_p7 }
  0x5e   : > { %p2356_p2 = pnand %p2355_p12, %p2351_p10 }
  0x60   : > { %2359 = shalt.err (!%p2356_p2)
}
  0x61   : > { %s3466_s19 = smov 8   ;;  %s3467_s7 = smov 128  }
  0x62   : > { %2087 = dma.hbm_to_vmem [thread:$0]  (!%p2703_p8), %s448_s27, 1024, %s450_s21, %s437_s12, %s3467_s7, %s3467_s7, %s3466_s19  }
  0x63   : > { %s492_s30 = scalar_lea.hbm %s3412_s2, %s2701_s25  ;;  %s486_s18 = scalar_lea.vmem [#allocation9], %s2698_s20 }
  0x64   : > { %s495_s17 = sshll.u32 %s486_s18, 4  ;;  %s493_s16 = sshll.u32 %s492_s30, 4  ;;  %s496_s17 = int_to_ptr.vmem [resolvable:$true] %s495_s17  ;;  %s494_s16 = int_to_ptr.hbm [resolvable:$true] %s493_s16 }
  0x65   : > { %s2375_s1 = sshra.s32 %s494_s16, 4  ;;  %s2382_s21 = scalar_lea.hbm %s3412_s2, 128  ;;  %s2376_s1 = int_to_ptr.hbm [resolvable:$true] %s2375_s1 }
  0x66   : > { %s2377_s24 = scalar_lea.hbm %s2376_s1, 64  ;;  %p2383_p10 = scmp.lt.s32.totalorder %s2376_s1, %s3412_s2 }
  0x67   : > { %p2378_p5 = scmp.ne.s32.totalorder %s2376_s1, %s2377_s24  ;;  %p2384_p6 = scmp.lt.s32.totalorder %s2382_s21, %s2377_s24 }
  0x69   : > { %p2380_p1 = pnand %p2378_p5, %p2244_p9  ;;  %p2385_p11 = por %p2384_p6, %p2383_p10 }
  0x6b   : > { %p2381_p7 = pneg %p2380_p1 }
  0x6d   : > { %p2386_p12 = pnand %p2385_p11, %p2381_p7 }
  0x6f   : > { %2389 = shalt.err (!%p2386_p12)
}
  0x70   : > { %2093 = dma.hbm_to_vmem [thread:$0]  (!%p2703_p8), %s494_s16, 1024, %s496_s17, %s2716_s11, %s3467_s7, %s3467_s7, %s3466_s19  }
  0x71   : > { %507 = sbr.rel (%p2639_p3) target bundleno = 1121 (0x461), region = 64  ;;  %s2801_s20 = sand.u32 (!%p2639_p3), 1, %s2523_s22  }
  0x72   : > { %s2804_s25 = sshll.u32 (!%p2639_p3), %s2801_s20, 6  ;;  %s510_s15 = scalar_lea.sflag (!%p2639_p3), [#allocation3], %s2801_s20 }
  0x73   : > { %s2808_s9 = scalar_lea.vmem (!%p2639_p3), [#allocation2], %s2804_s25 }
  0x76   : > { %2478 = dma.done.wait (%p2682_p13), %s510_s15, 1024  }
  0x77   : > { %2480 = vsyncadd (%p2682_p13), %s510_s15, 4294966272  ;;  %s519_s11 = sand.u32 1, %s2634_s28   ;;  %s2816_s13 = scalar_lea.vmem [#allocation7], %s2804_s25 }
  0x78   : > { %s520_s29 = scalar_lea.sflag [#allocation8], %s519_s11 }
  0x79   : > { %2482 = dma.done.wait (%p2682_p13), %s520_s29, 2048  }
  0x7a   : > { %2484 = vsyncadd (%p2682_p13), %s520_s29, 4294965248  ;;  %s2823_s19 = scalar_lea.vmem [#allocation9], %s2804_s25  ;;  %p3468_p3 = scmp.eq.s32.totalorder %s2634_s28, 0 }
  0x7c   : > { %2486 = dma.done.wait (%p3468_p3), [#allocation5], 64   ;;  %p3469_p8 = pmov %p3468_p3 }
  0x7d   : > { %p3470_p9 = pmov %p3468_p3 }
  0x7e   : > { %2488 = vsyncadd (%p3469_p8), [#allocation5], 4294967232 }
  0x7f   : > { %2490 = dma.done.wait (%p3470_p9), [#allocation12], 16   ;;  %p3471_p2 = pmov %p3468_p3 }
  0x81   : > { %2492 = vsyncadd (%p3471_p2), [#allocation12], 4294967280  ;;  %p3472_p5 = pmov %p3471_p2 }
  0x82   : > { %p3473_p13 = pmov %p3471_p2 }
  0x83   : > { %2494 = dma.done.wait (%p3472_p5), [#allocation6], 64  }
  0x84   : > { %2496 = vsyncadd (%p3473_p13), [#allocation6], 4294967232  ;;  %p3474_p1 = pmov %p3471_p2 }
  0x86   : > { %2498 = dma.done.wait (%p3474_p1), [#allocation12], 16   ;;  %p3475_p7 = pmov %p3474_p1 }
  0x87   : > { %p3476_p10 = pmov %p3474_p1 }
  0x88   : > { %2500 = vsyncadd (%p3475_p7), [#allocation12], 4294967280 }
  0x89   : > { %2502 = dma.done.wait (%p3476_p10), [#allocation16], 80   ;;  %p3477_p6 = pmov %p3474_p1 }
  0x8a   : > { %p3478_p11 = pmov %p3474_p1 }
  0x8b   : > { %2504 = vsyncadd (%p3477_p6), [#allocation16], 4294967216 }
  0x8c   : > { %2506 = dma.done.wait (%p3478_p11), [#allocation19], 80   ;;  %p3479_p12 = pmov %p3474_p1 }
  0x8e   : > { %2508 = vsyncadd (%p3479_p12), [#allocation19], 4294967216 }
  0x8f   : > { %579 = sfence }
  0x90   : > { %s751_s14 = sld [smem:[#allocation13]]  ;;  %v2850_v0 = vld [vmem:[%s2816_s13] sm:$0xff]  ;;  %v2853_v1 = vld [vmem:[%s2816_s13 + $0x8] sm:$0xff]  ;;  %v2858_v2 = vld [vmem:[%s2816_s13 + $0x10] sm:$0xff]  ;;  %vm983_vm0 = vcmask 130048  }
  0x91   : > { %s1895_s7 = sld [smem:[#allocation13 + $0x1]]  ;;  %v2861_v3 = vld [vmem:[%s2816_s13 + $0x18] sm:$0xff]  ;;  %v2866_v5 = vld [vmem:[%s2816_s13 + $0x20] sm:$0xff]  ;;  %v2869_v6 = vld [vmem:[%s2816_s13 + $0x28] sm:$0xff] }
  0x92   : > { %s1898_s30 = sld [smem:[#allocation13 + $0x2]]  ;;  %v2876_v10 = vld [vmem:[%s2816_s13 + $0x30] sm:$0xff]  ;;  %v2879_v11 = vld [vmem:[%s2816_s13 + $0x38] sm:$0xff]  ;;  %v2890_v18 = vld [vmem:[%s2808_s9] sm:$0xff] }
  0x93   : > { %s1901_s18 = sld [smem:[#allocation13 + $0x3]]  ;;  %v2897_v23 = vld [vmem:[%s2808_s9 + $0x10] sm:$0xff]  ;;  %v2900_v24 = vld [vmem:[%s2808_s9 + $0x8] sm:$0xff]  ;;  %v2903_v25 = vld [vmem:[%s2808_s9 + $0x18] sm:$0xff] }
  0x94   : > { %s2855_s17 = sld [smem:[#allocation14]]  ;;  %v2910_v28 = vld [vmem:[%s2808_s9 + $0x20] sm:$0xff]  ;;  %v2917_v33 = vld [vmem:[%s2808_s9 + $0x30] sm:$0xff]  ;;  %v2926_v38 = vld [vmem:[%s2808_s9 + $0x28] sm:$0xff] }
  0x95   : > { %s2863_s16 = sld [smem:[#allocation10]]  ;;  %v2929_v39 = vld [vmem:[%s2808_s9 + $0x38] sm:$0xff] }
  0x96   : > { %v754_v4 = vstv %s751_s14  ;;  %s2871_s1 = sld [smem:[#allocation10 + $0x1]] }
  0x97   : > { %v755_v7 = vmul.f32 %v754_v4, %v2850_v0  ;;  %v756_v8 = vmul.f32 %v754_v4, %v2853_v1  ;;  %v761_v9 = vstv %s1895_s7  ;;  %s2881_s24 = sld [smem:[#allocation10 + $0x2]] }
  0x98   : > { %v762_v12 = vmul.f32 %v2858_v2, %v761_v9  ;;  %v763_v13 = vmul.f32 %v2861_v3, %v761_v9  ;;  %v770_v14 = vstv %s1898_s30  ;;  %s2885_s4 = sld [smem:[#allocation10 + $0x3]] }
  0x99   : > { %v771_v15 = vmul.f32 %v2866_v5, %v770_v14  ;;  %v772_v16 = vmul.f32 %v2869_v6, %v770_v14  ;;  %v779_v17 = vstv %s1901_s18  ;;  %s2892_s26 = sld [smem:[#allocation11]] }
  0x9a   : > { %v764_v19 = vadd.f32 %v762_v12, %v755_v7  ;;  %v765_v20 = vadd.f32 %v763_v13, %v756_v8  ;;  %v780_v21 = vmul.f32 %v2876_v10, %v779_v17  ;;  %v781_v22 = vmul.f32 %v2879_v11, %v779_v17  ;;  %s2905_s21 = sld [smem:[#allocation13 + $0x80]] }
  0x9b   : > { %v785_v26 = vstv %s2855_s17  ;;  %v639_v27 = vstv %s2863_s16  ;;  %s2912_s27 = sld [smem:[#allocation13 + $0x81]] }
  0x9c   : > { %v773_v29 = vadd.f32 %v771_v15, %v764_v19  ;;  %v774_v30 = vadd.f32 %v772_v16, %v765_v20  ;;  %v640_v31 = vmul.f32 %v639_v27, %v2890_v18  ;;  %v646_v32 = vstv %s2871_s1  ;;  %s2919_s12 = sld [smem:[#allocation13 + $0x82]] }
  0x9d   : > { %v647_v34 = vmul.f32 %v2897_v23, %v646_v32  ;;  %v655_v35 = vstv %s2881_s24  ;;  %v641_v36 = vmul.f32 %v639_v27, %v2900_v24  ;;  %v648_v37 = vmul.f32 %v2903_v25, %v646_v32  ;;  %s2931_s15 = sld [smem:[#allocation13 + $0x83]] }
  0x9e   : > { %v782_v40 = vadd.f32 %v780_v21, %v773_v29  ;;  %v783_v41 = vadd.f32 %v781_v22, %v774_v30  ;;  %v656_v42 = vmul.f32 %v2910_v28, %v655_v35  ;;  %v664_v43 = vstv %s2885_s4  ;;  %s2935_s11 = sld [smem:[#allocation14 + $0x1]] }
  0x9f   : > { %v649_v44 = vadd.f32 %v647_v34, %v640_v31  ;;  %v665_v45 = vmul.f32 %v2917_v33, %v664_v43  ;;  %v650_v46 = vadd.f32 %v648_v37, %v641_v36  ;;  %s2938_s29 = sld [smem:[#allocation10 + $0x80]]  ;;  %v670_v48 = vstv %s2892_s26 }
  0xa0   : > { %v787_v47 = vadd.f32 %v785_v26, %v783_v41  ;;  %v657_v49 = vmul.f32 %v2926_v38, %v655_v35  ;;  %v666_v50 = vmul.f32 %v2929_v39, %v664_v43  ;;  %s2943_s9 = sld [smem:[#allocation10 + $0x81]]  ;;  %v786_v51 = vadd.f32 %v785_v26, %v782_v40 }
  0xa1   : > { %v658_v52 = vadd.f32 %v656_v42, %v649_v44  ;;  %v789_v53 = vstv %s2905_s21  ;;  %v793_v54 = vstv %s2912_s27  ;;  %s2947_s13 = sld [smem:[#allocation10 + $0x82]] }
  0xa2   : > { %1943 = vmatpush.xpose.msk.msra.mxu0 %vm983_vm0, %v787_v47  ;;  %v659_v55 = vadd.f32 %v657_v49, %v650_v46  ;;  %v790_v56 = vmul.f32 %v789_v53, %v2850_v0  ;;  %v791_v57 = vmul.f32 %v789_v53, %v2853_v1  ;;  %v794_v58 = vmul.f32 %v2858_v2, %v793_v54  ;;  %s2953_s14 = sld [smem:[#allocation10 + $0x83]] }
  0xa3   : > { %v667_v59 = vadd.f32 %v665_v45, %v658_v52  ;;  %v795_v60 = vmul.f32 %v2861_v3, %v793_v54  ;;  %v799_v61 = vstv %s2919_s12  ;;  %v805_v62 = vstv %s2931_s15  ;;  %s2962_s7 = sld [smem:[#allocation11 + $0x1]] }
  0xa4   : > { %v668_v63 = vadd.f32 %v666_v50, %v659_v55  ;;  %v796_v4 = vadd.f32 %v794_v58, %v790_v56  ;;  %v800_v7 = vmul.f32 %v2866_v5, %v799_v61  ;;  %v801_v8 = vmul.f32 %v2869_v6, %v799_v61  ;;  %s1914_s30 = sld [smem:[#allocation13 + $0x180]] }
  0xa5   : > { %v671_v9 = vadd.f32 %v670_v48, %v667_v59  ;;  %v797_v12 = vadd.f32 %v795_v60, %v791_v57  ;;  %v806_v13 = vmul.f32 %v2876_v10, %v805_v62  ;;  %v807_v14 = vmul.f32 %v2879_v11, %v805_v62  ;;  %s1915_s18 = sld [smem:[#allocation13 + $0x181]] }
  0xa6   : > { %1944 = vmatpush.xpose.msk.msra.mxu0 %vm983_vm0, %v786_v51  ;;  %v802_v15 = vadd.f32 %v800_v7, %v796_v4  ;;  %v674_v16 = vstv %s2938_s29  ;;  %v678_v21 = vstv %s2943_s9  ;;  %v672_v22 = vadd.f32 %v670_v48, %v668_v63  ;;  %s1916_s17 = sld [smem:[#allocation13 + $0x182]] }
  0xa7   : > { %v981_v17 = vmul.f32 0.25, %v671_v9  ;;  %v803_v19 = vadd.f32 %v801_v8, %v797_v12  ;;  %v675_v20 = vmul.f32 %v674_v16, %v2890_v18  ;;  %v811_v26 = vstv %s2935_s11  ;;  %s1917_s16 = sld [smem:[#allocation13 + $0x183]] }
  0xa8   : > { %v679_v27 = vmul.f32 %v2897_v23, %v678_v21  ;;  %v684_v29 = vstv %s2947_s13  ;;  %v808_v30 = vadd.f32 %v806_v13, %v802_v15  ;;  %v690_v34 = vstv %s2953_s14  ;;  %s2990_s1 = sld [smem:[#allocation10 + $0x180]] }
  0xa9   : > { %1945 = vmatmul.msk.f32.vlgmr.msra.gmra.mxu0 %vm983_vm0, %v981_v17  ;;  %v809_v31 = vadd.f32 %v807_v14, %v803_v19  ;;  %v685_v32 = vmul.f32 %v2910_v28, %v684_v29  ;;  %v691_v36 = vmul.f32 %v2917_v33, %v690_v34  ;;  %v982_v41 = vmul.f32 0.25, %v672_v22  ;;  %s2992_s24 = sld [smem:[#allocation10 + $0x181]] }
  0xaa   : > { %v681_v35 = vadd.f32 %v679_v27, %v675_v20  ;;  %v812_v42 = vadd.f32 %v811_v26, %v808_v30  ;;  %v696_v43 = vstv %s2962_s7  ;;  %s2994_s4 = sld [smem:[#allocation14 + $0x3]]  ;;  %v841_v47 = vstv %s1914_s30 }
  0xab   : > { %v813_v37 = vadd.f32 %v811_v26, %v809_v31  ;;  %v845_v48 = vstv %s1915_s18  ;;  %s2996_s26 = sld [smem:[#allocation10 + $0x182]]  ;;  %v843_v49 = vmul.f32 %v841_v47, %v2853_v1  ;;  %v842_v57 = vmul.f32 %v841_v47, %v2850_v0 }
  0xac   : > { %v687_v40 = vadd.f32 %v685_v32, %v681_v35  ;;  %v847_v50 = vmul.f32 %v2861_v3, %v845_v48  ;;  %v851_v51 = vstv %s1916_s17  ;;  %s3000_s21 = sld [smem:[#allocation10 + $0x183]]  ;;  %v846_v58 = vmul.f32 %v2858_v2, %v845_v48 }
  0xad   : > { %1949 = vmatpush.xpose.msk.msra.mxu2 %vm983_vm0, %v813_v37  ;;  %v853_v53 = vmul.f32 %v2869_v6, %v851_v51  ;;  %v857_v54 = vstv %s1917_s16  ;;  %s3006_s27 = sld [smem:[#allocation11 + $0x3]]  ;;  %v852_v63 = vmul.f32 %v2866_v5, %v851_v51  ;;  %v686_v48 = vmul.f32 %v2926_v38, %v684_v29 }
  0xae   : > { %v693_v44 = vadd.f32 %v691_v36, %v687_v40  ;;  %v849_v52 = vadd.f32 %v847_v50, %v843_v49  ;;  %v859_v56 = vmul.f32 %v2879_v11, %v857_v54  ;;  %v726_v59 = vstv %s2990_s1  ;;  %s866_s12 = sld [smem:[#allocation15]] }
  0xaf   : > { %v730_v60 = vstv %s2992_s24  ;;  %v848_v62 = vadd.f32 %v846_v58, %v842_v57  ;;  %v727_v4 = vmul.f32 %v726_v59, %v2890_v18  ;;  %v858_v14 = vmul.f32 %v2876_v10, %v857_v54  ;;  %s1919_s15 = sld [smem:[#allocation15 + $0x1]]  ;;  %s3184_s24 = scalar_lea.vmem [#allocation22], %s2804_s25 }
  0xb0   : > { %v697_v45 = vadd.f32 %v696_v43, %v693_v44  ;;  %v855_v55 = vadd.f32 %v853_v53, %v849_v52  ;;  %v863_v7 = vstv %s2994_s4  ;;  %v731_v8 = vmul.f32 %v2897_v23, %v730_v60  ;;  %s1922_s11 = sld [smem:[#allocation15 + $0x2]] }
  0xb1   : > { %1946 = vmatmul.msk.f32.gmra.mxu0 %vm983_vm0, %v982_v41  ;;  %1950 = vmatpush.xpose.msk.msra.mxu2 %vm983_vm0, %v812_v42  ;;  %v736_v9 = vstv %s2996_s26  ;;  %v854_v13 = vadd.f32 %v852_v63, %v848_v62  ;;  %v692_v50 = vmul.f32 %v2929_v39, %v690_v34  ;;  %s1925_s29 = sld [smem:[#allocation15 + $0x3]] }
  0xb2   : > { %v1098_v46 = vmul.f32 0.25, %v697_v45  ;;  %v861_v61 = vadd.f32 %v859_v56, %v855_v55  ;;  %v737_v15 = vmul.f32 %v2910_v28, %v736_v9  ;;  %v733_v17 = vadd.f32 %v731_v8, %v727_v4  ;;  %s3073_s9 = sld [smem:[#allocation17]] }
  0xb3   : > { %v742_v19 = vstv %s3000_s21  ;;  %v860_v20 = vadd.f32 %v858_v14, %v854_v13  ;;  %v748_v30 = vstv %s3006_s27  ;;  %v676_v45 = vmul.f32 %v674_v16, %v2900_v24  ;;  %v3068_v13 = vld [vmem:[%s2823_s19 + $0x8] sm:$0xff]  ;;  %s3089_s13 = sld [smem:[#allocation13 + $0x100]] }
  0xb4   : > { %1951 = vmatmul.msk.f32.vlgmr.msra.gmra.mxu2 %vm983_vm0, %v1098_v46  ;;  %v865_v12 = vadd.f32 %v863_v7, %v861_v61  ;;  %v743_v22 = vmul.f32 %v2917_v33, %v742_v19  ;;  %v739_v26 = vadd.f32 %v737_v15, %v733_v17  ;;  %v680_v46 = vmul.f32 %v2903_v25, %v678_v21  ;;  %v3071_v15 = vld [vmem:[%s2823_s19 + $0x18] sm:$0xff]  ;;  %s3097_s14 = sld [smem:[#allocation13 + $0x101]] }
  0xb5   : > { %v864_v27 = vadd.f32 %v863_v7, %v860_v20  ;;  %v869_v14 = vstv %s866_s12  ;;  %v876_v17 = vstv %s1919_s15  ;;  %s1911_s7 = sld [smem:[#allocation13 + $0x102]] }
  0xb6   : > { %1965 = vmatpush.xpose.msk.msrb.mxu0 %vm983_vm0, %v865_v12  ;;  %v745_v31 = vadd.f32 %v743_v22, %v739_v26  ;;  %v682_v47 = vadd.f32 %v680_v46, %v676_v45  ;;  %v871_v20 = vmul.f32 %v869_v14, %v3068_v13  ;;  %v878_v22 = vmul.f32 %v3071_v15, %v876_v17  ;;  %v3078_v26 = vld [vmem:[%s2823_s19 + $0x28] sm:$0xff]  ;;  %s1912_s30 = sld [smem:[#allocation13 + $0x103]] }
  0xb7   : > { %s3106_s18 = sld [smem:[#allocation14 + $0x2]] }
  0xb8   : > { %v749_v32 = vadd.f32 %v748_v30, %v745_v31  ;;  %v688_v49 = vadd.f32 %v686_v48, %v682_v47  ;;  %v3081_v31 = vld [vmem:[%s2823_s19] sm:$0xff]  ;;  %s3116_s17 = sld [smem:[#allocation15 + $0x81]] }
  0xb9   : > { %s3121_s16 = sld [smem:[#allocation15 + $0x82]] }
  0xba   : > { %1966 = vmatpush.xpose.msk.msrb.mxu0 %vm983_vm0, %v864_v27  ;;  %v1332_v35 = vmul.f32 0.25, %v749_v32  ;;  %v694_v51 = vadd.f32 %v692_v50, %v688_v49  ;;  %v885_v27 = vstv %s1922_s11  ;;  %v3084_v32 = vld [vmem:[%s2823_s19 + $0x10] sm:$0xff]  ;;  %s3124_s4 = sld [smem:[#allocation15 + $0x83]] }
  0xbb   : > { %v3102_v49 = vld [vmem:[%s2823_s19 + $0x30] sm:$0xff]  ;;  %s3127_s12 = sld [smem:[#allocation10 + $0x100]] }
  0xbc   : > { %v698_v52 = vadd.f32 %v696_v43, %v694_v51  ;;  %s3130_s15 = sld [smem:[#allocation17 + $0x1]] }
  0xbd   : > { %1967 = vmatmul.msk.f32.vlgmr.msrb.gmra.mxu0 %vm983_vm0, %v1332_v35  ;;  %v880_v35 = vadd.f32 %v878_v22, %v871_v20  ;;  %s3132_s11 = sld [smem:[#allocation10 + $0x101]] }
  0xbe   : > { %v1099_v53 = vmul.f32 0.25, %v698_v52  ;;  %s3176_s1 = sld [smem:[#allocation11 + $0x2]] }
  0xbf   : > { %s1938_s26 = sld [smem:[#allocation15 + $0x180]] }
  0xc0   : > { %1952 = vmatmul.msk.f32.gmra.mxu2 %vm983_vm0, %v1099_v53  ;;  %v900_v53 = vstv %s3073_s9  ;;  %s3156_s9 = sld [smem:[#allocation10 + $0x103]] }
  0xc1   : > { %s1939_s21 = sld [smem:[#allocation15 + $0x181]] }
  0xc2   : > { %s1940_s27 = sld [smem:[#allocation15 + $0x182]] }
 0x126   : > { %v1013_v36 = vpop.f32.mrf.mxu0 }
 0x127   : > { %v1019_v37 = vsel %vm983_vm0, %v1013_v36, -inf }
 0x128   : > { %1020 = vmax.xlane.f32.xlu0 %v1019_v37  ;;  %v870_v37 = vmul.f32 %v869_v14, %v3081_v31 }
 0x12e   : > { %v1016_v40 = vpop.f32.mrf.mxu0 }
 0x12f   : > { %v1022_v41 = vsel %vm983_vm0, %v1016_v40, -inf }
 0x130   : > { %1023 = vmax.xlane.f32.xlu0 %v1022_v41  ;;  %v3092_v41 = vld [vmem:[%s2823_s19 + $0x38] sm:$0xff] }
 0x137   : > { %v1129_v42 = vpop.f32.mrf.mxu2 }
 0x138   : > { %v1135_v44 = vsel %vm983_vm0, %v1129_v42, -inf }
 0x139   : > { %1136 = vmax.xlane.f32.xlu2 %v1135_v44  ;;  %v3095_v44 = vld [vmem:[%s2823_s19 + $0x20] sm:$0xff]  ;;  %s3113_s19 = sld [smem:[#allocation15 + $0x80]] }
 0x13a   : > { %v3059_v4 = vpop.f32.mrf.mxu0  ;;  %v886_v48 = vmul.f32 %v3095_v44, %v885_v27 }
 0x13b   : > { %v1369_v7 = vsel %vm983_vm0, %v3059_v4, -inf }
 0x19b   : > { %v1021_v54 = vpop.xlane.xlu0 %1020 }
 0x19c   : > { %v1025_v55 = vsub.f32 %v1013_v36, %v1021_v54  ;;  %v887_v36 = vmul.f32 %v3078_v26, %v885_v27 }
 0x19e   : > { %v1027_v16 = vmul.f32 1.442695, %v1025_v55  ;;  %v889_v45 = vadd.f32 %v887_v36, %v880_v35  ;;  %v908_v35 = vstv %s3116_s17  ;;  %s1937_s17 = sld [smem:[#allocation17 + $0x2]] }
 0x1a0   : > { %2163 = vpow2.f32 %v1027_v16 }
 0x1a3   : > { %v1024_v56 = vpop.xlane.xlu0 %1023 }
 0x1a4   : > { %v1026_v21 = vsub.f32 %v1016_v40, %v1024_v56  ;;  %v877_v40 = vmul.f32 %v3084_v32, %v876_v17  ;;  %v815_v56 = vstv %s3089_s13  ;;  %s1941_s13 = sld [smem:[#allocation15 + $0x183]] }
 0x1a5   : > { %v816_v14 = vmul.f32 %v815_v56, %v2850_v0 }
 0x1a6   : > { %v3051_v57 = vpop.eup %2163  ;;  %v1029_v58 = vmul.f32 1.442695, %v1026_v21  ;;  %v879_v47 = vadd.f32 %v877_v40, %v870_v37  ;;  %v819_v21 = vstv %s3097_s14  ;;  %v910_v37 = vmul.f32 %v3071_v15, %v908_v35  ;;  %s1942_s14 = sld [smem:[#allocation17 + $0x3]] }
 0x1a7   : > { %v1031_v29 = vsel %vm983_vm0, %v3051_v57, 0.0  ;;  %v820_v17 = vmul.f32 %v2858_v2, %v819_v21  ;;  %v904_v2 = vstv %s3113_s19  ;;  %v914_v40 = vstv %s3121_s16  ;;  %s1936_s19 = sld [smem:[#allocation15 + $0x103]] }
 0x1a8   : > { %2165 = vpow2.f32 %v1029_v58  ;;  %1032 = vadd.xlane.f32.xlu1 %v1031_v29  ;;  %v888_v51 = vadd.f32 %v886_v48, %v879_v47  ;;  %v817_v58 = vmul.f32 %v815_v56, %v2853_v1  ;;  %v821_v29 = vmul.f32 %v2861_v3, %v819_v21 }
 0x1a9   : > { %v837_v1 = vstv %s3106_s18  ;;  %v822_v20 = vadd.f32 %v820_v17, %v816_v14  ;;  %v906_v36 = vmul.f32 %v904_v2, %v3068_v13  ;;  %v905_v48 = vmul.f32 %v904_v2, %v3081_v31  ;;  %s1935_s18 = sld [smem:[#allocation15 + $0x102]] }
 0x1aa   : > { %v704_v56 = vstv %s3132_s11  ;;  %v738_v17 = vmul.f32 %v2926_v38, %v736_v9  ;;  %s3481_s11 = sld [smem:[#allocation46_spill]] }
 0x1ac   : > { %v1137_v34 = vpop.xlane.xlu2 %1136 }
 0x1ad   : > { %v1141_v61 = vsub.f32 %v1129_v42, %v1137_v34  ;;  %v894_v42 = vstv %s1925_s29  ;;  %v825_v34 = vstv %s1911_s7  ;;  %s3142_s29 = sld [smem:[#allocation10 + $0x102]] }
 0x1ae   : > { %v3055_v43 = vpop.eup %2165  ;;  %v896_v46 = vmul.f32 %v3092_v41, %v894_v42  ;;  %v895_v52 = vmul.f32 %v3102_v49, %v894_v42  ;;  %v912_v42 = vadd.f32 %v910_v37, %v906_v36  ;;  %s1933_s7 = sld [smem:[#allocation15 + $0x100]] }
 0x1af   : > { %v1034_v62 = vsel %vm983_vm0, %v3055_v43, 0.0  ;;  %v1143_v63 = vmul.f32 1.442695, %v1141_v61  ;;  %v823_v61 = vadd.f32 %v821_v29, %v817_v58 }
 0x1b0   : > { %1035 = vadd.xlane.f32.xlu1 %v1034_v62  ;;  %v898_v50 = vadd.f32 %v896_v46, %v889_v45  ;;  %v897_v55 = vadd.f32 %v895_v52, %v888_v51  ;;  %v827_v62 = vmul.f32 %v2869_v6, %v825_v34  ;;  %v826_v6 = vmul.f32 %v2866_v5, %v825_v34 }
 0x1b1   : > { %2167 = vpow2.f32 %v1143_v63  ;;  %v831_v63 = vstv %s1912_s30  ;;  %v916_v45 = vmul.f32 %v3078_v26, %v914_v40  ;;  %v920_v46 = vstv %s3124_s4  ;;  %s1934_s30 = sld [smem:[#allocation15 + $0x101]]  ;;  %s3440_s4 = sshll.u32 %s2634_s28, 6 }
 0x1b2   : > { %v902_v54 = vadd.f32 %v900_v53, %v898_v50  ;;  %v901_v16 = vadd.f32 %v900_v53, %v897_v55  ;;  %v828_v22 = vadd.f32 %v826_v6, %v822_v20  ;;  %v832_v27 = vmul.f32 %v2876_v10, %v831_v63  ;;  %v3146_v50 = vpop.f32.mrf.mxu2 }
 0x1b3   : > { %v922_v47 = vmul.f32 %v3092_v41, %v920_v46  ;;  %v918_v51 = vadd.f32 %v916_v45, %v912_v42  ;;  %v909_v52 = vmul.f32 %v3084_v32, %v908_v35  ;;  %v700_v53 = vstv %s3127_s12 }
 0x1b4   : > { %1089 = vmatpush.msra.mxu1 %v902_v54  ;;  %v834_v0 = vadd.f32 %v832_v27, %v828_v22  ;;  %v1138_v54 = vsel %vm983_vm0, %v3146_v50, -inf  ;;  %v926_v55 = vstv %s3130_s15  ;;  %v921_v29 = vmul.f32 %v3102_v49, %v920_v46 }
 0x1b5   : > { %1139 = vmax.xlane.f32.xlu2 %v1138_v54  ;;  %v924_v21 = vadd.f32 %v922_v47, %v918_v51  ;;  %v911_v58 = vadd.f32 %v909_v52, %v905_v48  ;;  %v710_v27 = vstv %s3142_s29  ;;  %s1600_s29 = scalar_lea.hbm %s3481_s11, %s3440_s4 }
 0x1b6   : > { %1090 = vmatpush.msra.mxu1 %v901_v16  ;;  %v838_v5 = vadd.f32 %v837_v1, %v834_v0  ;;  %v915_v16 = vmul.f32 %v3095_v44, %v914_v40 }
 0x1b7   : > { %v3063_v8 = vpop.eup %2167 }
 0x1b8   : > { %1370 = vmax.xlane.f32.xlu1 %v1369_v7  ;;  %v1147_v12 = vsel %vm983_vm0, %v3063_v8, 0.0  ;;  %v833_v7 = vmul.f32 %v2879_v11, %v831_v63  ;;  %v917_v14 = vadd.f32 %v915_v16, %v911_v58  ;;  %v702_v16 = vmul.f32 %v700_v53, %v2900_v24 }
 0x1ba   : > { %v923_v6 = vadd.f32 %v921_v29, %v917_v14 }
 0x1bc   : > { %v927_v2 = vadd.f32 %v926_v55, %v923_v6 }
 0x1c0   : > { %1148 = vadd.xlane.f32.xlu1 %v1147_v12  ;;  %v829_v12 = vadd.f32 %v827_v62, %v823_v61  ;;  %v728_v61 = vmul.f32 %v726_v59, %v2900_v24  ;;  %v732_v62 = vmul.f32 %v2903_v25, %v730_v60  ;;  %v744_v60 = vmul.f32 %v2929_v39, %v742_v19 }
 0x1c1   : > { %v716_v19 = vstv %s3156_s9  ;;  %s1601_s9 = sshll.u32 %s3184_s24, 4  ;;  %s1602_s9 = int_to_ptr.vmem [resolvable:$true] %s1601_s9 }
 0x1c2   : > { %v835_v3 = vadd.f32 %v833_v7, %v829_v12  ;;  %v928_v12 = vadd.f32 %v926_v55, %v924_v21  ;;  %v734_v59 = vadd.f32 %v732_v62, %v728_v61  ;;  %v717_v52 = vmul.f32 %v2917_v33, %v716_v19 }
 0x1c3   : > { %v712_v61 = vmul.f32 %v2926_v38, %v710_v27 }
 0x1c4   : > { %v839_v11 = vadd.f32 %v837_v1, %v835_v3  ;;  %v701_v1 = vmul.f32 %v700_v53, %v2890_v18  ;;  %v705_v3 = vmul.f32 %v2897_v23, %v704_v56  ;;  %1206 = vmatpush.msra.mxu3 %v928_v12  ;;  %v740_v9 = vadd.f32 %v738_v17, %v734_v59 }
 0x1c5   : > { %v711_v23 = vmul.f32 %v2910_v28, %v710_v27  ;;  %v718_v17 = vmul.f32 %v2929_v39, %v716_v19 }
 0x1c6   : > { %1957 = vmatpush.xpose.msk.msrb.mxu1 %vm983_vm0, %v839_v11  ;;  %v707_v35 = vadd.f32 %v705_v3, %v701_v1  ;;  %1207 = vmatpush.msra.mxu3 %v927_v2 }
 0x1c8   : > { %v713_v51 = vadd.f32 %v711_v23, %v707_v35  ;;  %v956_v35 = vstv %s1938_s26  ;;  %s1570_s26 = scalar_lea.sflag [#allocation23], %s2801_s20 }
 0x1c9   : > { %v958_v23 = vmul.f32 %v956_v35, %v3068_v13  ;;  %v957_v19 = vmul.f32 %v956_v35, %v3081_v31 }
 0x1ca   : > { %1958 = vmatpush.xpose.msk.msrb.mxu1 %vm983_vm0, %v838_v5  ;;  %v746_v5 = vadd.f32 %v744_v60, %v740_v9 }
 0x21b   : > { %v1033_v10 = vpop.xlane.xlu1 %1032 }
 0x21c   : > { %2169 = vrcp.f32 %v1033_v10  ;;  %v1048_v11 = vand.u32 2147483648, %v1033_v10  ;;  %v1046_v22 = vand.u32 2147483647, %v1033_v10  ;;  %vm1042_vm2 = vweird.f32 %v1033_v10 }
 0x21e   : > { %v1049_v37 = vor.u32 1.1754944e-38, %v1048_v11  ;;  %vm1047_vm4 = vcmp.eq.f32.partialorder %v1046_v22, 8.507059e+37 }
 0x222   : > { %v2170_v34 = vpop.eup %2169 }
 0x223   : > { %v1038_v63 = vmul.f32 %v2170_v34, %v1033_v10  ;;  %v1036_v7 = vpop.xlane.xlu1 %1035  ;;  %vm1043_vm1 = vweird.f32 %v2170_v34  ;;  %v750_v10 = vadd.f32 %v748_v30, %v746_v5 }
 0x224   : > { %2171 = vrcp.f32 %v1036_v7  ;;  %vm1044_vm3 = vmor %vm1042_vm2, %vm1043_vm1  ;;  %v1062_v54 = vand.u32 2147483648, %v1036_v7  ;;  %v1060_v30 = vand.u32 2147483647, %v1036_v7  ;;  %vm1056_vm6 = vweird.f32 %v1036_v7 }
 0x225   : > { %v1039_v20 = vsub.f32 1.0, %v1038_v63  ;;  %v1333_v21 = vmul.f32 0.25, %v750_v10  ;;  %v722_v63 = vstv %s3176_s1  ;;  %s1603_s1 = sshll.u32 %s1600_s29, 4  ;;  %s1604_s1 = int_to_ptr.hbm [resolvable:$true] %s1603_s1 }
 0x226   : > { %v1063_v33 = vor.u32 1.1754944e-38, %v1062_v54  ;;  %vm1061_vm8 = vcmp.eq.f32.partialorder %v1060_v30, 8.507059e+37 }
 0x227   : > { %v1040_v0 = vmul.f32 %v2170_v34, %v1039_v20  ;;  %1968 = vmatmul.msk.f32.gmra.mxu0 %vm983_vm0, %v1333_v21 }
 0x229   : > { %v1041_v18 = vadd.f32 %v2170_v34, %v1040_v0 }
 0x22a   : > { %v2172_v36 = vpop.eup %2171 }
 0x22b   : > { %v1052_v40 = vmul.f32 %v2172_v36, %v1036_v7  ;;  %v1371_v42 = vpop.xlane.xlu1 %1370  ;;  %v1045_v45 = vsel %vm1044_vm3, %v2170_v34, %v1041_v18  ;;  %vm1057_vm5 = vweird.f32 %v2172_v36  ;;  %v960_v18 = vstv %s1939_s21  ;;  %s2419_s21 = sshra.s32 %s1604_s1, 4  ;;  %s2420_s21 = int_to_ptr.hbm [resolvable:$true] %s2419_s21 }
 0x22c   : > { %v1375_v46 = vsub.f32 %v3059_v4, %v1371_v42  ;;  %v1050_v47 = vsel %vm1047_vm4, %v1049_v37, %v1045_v45  ;;  %vm1058_vm7 = vmor %vm1056_vm6, %vm1057_vm5  ;;  %v719_v4 = vadd.f32 %v717_v52, %v713_v51  ;;  %v962_v5 = vmul.f32 %v3071_v15, %v960_v18  ;;  %p2426_p2 = scmp.lt.s32.totalorder %s2420_s21, %s3481_s11 }
 0x22d   : > { %v1053_v48 = vsub.f32 1.0, %v1052_v40  ;;  %v1065_v28 = vmul.f32 %v3051_v57, %v1050_v47  ;;  %v706_v57 = vmul.f32 %v2903_v25, %v704_v56  ;;  %v961_v40 = vmul.f32 %v3084_v32, %v960_v18 }
 0x22e   : > { %v1377_v55 = vmul.f32 1.442695, %v1375_v46  ;;  %v723_v7 = vadd.f32 %v722_v63, %v719_v4  ;;  %v964_v37 = vadd.f32 %v962_v5, %v958_v23  ;;  %v972_v42 = vstv %s1941_s13 }
 0x22f   : > { %v1054_v58 = vmul.f32 %v2172_v36, %v1053_v48  ;;  %1067 = vst.msk [vmem:[%s3184_s24] sm:$0xff] %vm983_vm0, %v1065_v28  ;;  %1947 = vmatmul.msk.f32.vlgmr.msra.gmra.mxu1 %vm983_vm0, %v1065_v28  ;;  %v708_v34 = vadd.f32 %v706_v57, %v702_v16  ;;  %v974_v46 = vmul.f32 %v3092_v41, %v972_v42  ;;  %v978_v52 = vstv %s1942_s14 }
 0x230   : > { %2173 = vpow2.f32 %v1377_v55  ;;  %v1215_v3 = vmul.f32 0.25, %v723_v7  ;;  %v963_v47 = vadd.f32 %v961_v40, %v957_v19  ;;  %v973_v51 = vmul.f32 %v3102_v49, %v972_v42 }
 0x231   : > { %v1055_v24 = vadd.f32 %v2172_v36, %v1054_v58  ;;  %v714_v14 = vadd.f32 %v712_v61, %v708_v34  ;;  %v1140_v34 = vpop.xlane.xlu2 %1139 }
 0x233   : > { %v1149_v53 = vpop.xlane.xlu1 %1148  ;;  %v1059_v29 = vsel %vm1058_vm7, %v2172_v36, %v1055_v24  ;;  %v720_v20 = vadd.f32 %v718_v17, %v714_v14  ;;  %v966_v36 = vstv %s1940_s27  ;;  %s2421_s27 = scalar_lea.hbm %s2420_s21, 64 }
 0x234   : > { %2175 = vrcp.f32 %v1149_v53  ;;  %v1064_v62 = vsel %vm1061_vm8, %v1063_v33, %v1059_v29  ;;  %v1164_v6 = vand.u32 2147483648, %v1149_v53  ;;  %vm1158_vm9 = vweird.f32 %v1149_v53  ;;  %p2422_p3 = scmp.ne.s32.totalorder %s2420_s21, %s2421_s27 }
 0x235   : > { %v1066_v25 = vmul.f32 %v3055_v43, %v1064_v62  ;;  %v1162_v59 = vand.u32 2147483647, %v1149_v53  ;;  %v724_v11 = vadd.f32 %v722_v63, %v720_v20  ;;  %v967_v10 = vmul.f32 %v3095_v44, %v966_v36 }
 0x236   : > { %v3194_v56 = vpop.eup %2173  ;;  %v1165_v22 = vor.u32 1.1754944e-38, %v1164_v6  ;;  %v1142_v63 = vsub.f32 %v3146_v50, %v1140_v34  ;;  %p2423_p8 = pnand %p2422_p3, %p2686_p0 }
 0x237   : > { %1068 = vst.msk [vmem:[%s3184_s24 + $0x8] sm:$0xff] %vm983_vm0, %v1066_v25  ;;  %1948 = vmatmul.msk.f32.gmra.mxu1 %vm983_vm0, %v1066_v25  ;;  %v1381_v12 = vsel %vm983_vm0, %v3194_v56, 0.0  ;;  %vm1163_vm12 = vcmp.eq.f32.partialorder %v1162_v59, 8.507059e+37  ;;  %v1216_v0 = vmul.f32 0.25, %v724_v11  ;;  %v969_v28 = vadd.f32 %v967_v10, %v963_v47 }
 0x238   : > { %1382 = vadd.xlane.f32.xlu1 %v1381_v12  ;;  %p2424_p9 = pneg %p2423_p8 }
 0x239   : > { %v975_v55 = vadd.f32 %v973_v51, %v969_v28 }
 0x23a   : > { %v2176_v38 = vpop.eup %2175 }
 0x23b   : > { %v1154_v1 = vmul.f32 %v2176_v38, %v1149_v53  ;;  %vm1159_vm10 = vweird.f32 %v2176_v38  ;;  %v979_v16 = vadd.f32 %v978_v52, %v975_v55 }
 0x23c   : > { %vm1160_vm11 = vmor %vm1158_vm9, %vm1159_vm10 }
 0x23d   : > { %v1155_v43 = vsub.f32 1.0, %v1154_v1 }
 0x23f   : > { %v1156_v60 = vmul.f32 %v2176_v38, %v1155_v43  ;;  %1959 = vmatmul.msk.f32.vlgmr.msrb.gmra.mxu1 %vm983_vm0, %v1215_v3 }
 0x241   : > { %v1157_v27 = vadd.f32 %v2176_v38, %v1156_v60 }
 0x243   : > { %v1161_v39 = vsel %vm1160_vm11, %v2176_v38, %v1157_v27  ;;  %v1145_v38 = vmul.f32 1.442695, %v1142_v63 }
 0x244   : > { %v1166_v2 = vsel %vm1163_vm12, %v1165_v22, %v1161_v39 }
 0x245   : > { %v1181_v9 = vmul.f32 %v3063_v8, %v1166_v2  ;;  %v968_v8 = vmul.f32 %v3078_v26, %v966_v36 }
 0x247   : > { %1953 = vst.msk [vmem:[%s3184_s24 + $0x10] sm:$0xff] %vm983_vm0, %v1181_v9  ;;  %1955 = vmatmul.msk.f32.vlgmr.msra.gmra.mxu3 %vm983_vm0, %v1181_v9  ;;  %1960 = vmatmul.msk.f32.gmra.mxu1 %vm983_vm0, %v1216_v0  ;;  %v970_v45 = vadd.f32 %v968_v8, %v964_v37 }
 0x249   : > { %v976_v48 = vadd.f32 %v974_v46, %v970_v45 }
 0x24b   : > { %v980_v54 = vadd.f32 %v978_v52, %v976_v48  ;;  %v930_v52 = vstv %s1933_s7  ;;  %s2425_s7 = scalar_lea.hbm %s3481_s11, 128 }
 0x24c   : > { %v932_v55 = vmul.f32 %v930_v52, %v3068_v13  ;;  %p2427_p5 = scmp.lt.s32.totalorder %s2425_s7, %s2421_s27 }
 0x24d   : > { %1440 = vmatpush.msrb.mxu2 %v980_v54  ;;  %v934_v54 = vstv %s1934_s30 }
 0x24e   : > { %p2428_p13 = por %p2427_p5, %p2426_p2 }
 0x24f   : > { %1441 = vmatpush.msrb.mxu2 %v979_v16  ;;  %v936_v16 = vmul.f32 %v3071_v15, %v934_v54 }
 0x250   : > { %p2429_p1 = pnand %p2428_p13, %p2424_p9 }
 0x2a4   : > { %v1366_v1 = vpop.f32.mrf.mxu0 }
 0x2a5   : > { %v1372_v3 = vsel %vm983_vm0, %v1366_v1, -inf }
 0x2ab   : > { %v1383_v21 = vpop.xlane.xlu1 %1382 }
 0x2ac   : > { %v3216_v58 = vpop.f32.mrf.mxu1  ;;  %2177 = vrcp.f32 %v1383_v21  ;;  %v1398_v33 = vand.u32 2147483648, %v1383_v21  ;;  %vm1392_vm13 = vweird.f32 %v1383_v21  ;;  %v1396_v53 = vand.u32 2147483647, %v1383_v21 }
 0x2ad   : > { %2179 = vpow2.f32 %v1145_v38 }
 0x2ae   : > { %v1399_v61 = vor.u32 1.1754944e-38, %v1398_v33  ;;  %vm1397_vm1 = vcmp.eq.f32.partialorder %v1396_v53, 8.507059e+37  ;;  %v946_v33 = vstv %s1936_s19  ;;  %v935_v53 = vmul.f32 %v3084_v32, %v934_v54 }
 0x2af   : > { %v948_v34 = vmul.f32 %v3092_v41, %v946_v33  ;;  %v947_v15 = vmul.f32 %v3102_v49, %v946_v33 }
 0x2b2   : > { %v2178_v30 = vpop.eup %2177 }
 0x2b3   : > { %v1388_v57 = vmul.f32 %v2178_v30, %v1383_v21  ;;  %vm1393_vm14 = vweird.f32 %v2178_v30  ;;  %v2180_v6 = vpop.eup %2179  ;;  %v940_v21 = vstv %s1935_s18 }
 0x2b4   : > { %v3218_v24 = vpop.f32.mrf.mxu1  ;;  %vm1394_vm15 = vmor %vm1392_vm13, %vm1393_vm14  ;;  %v1150_v43 = vsel %vm983_vm0, %v2180_v6, 0.0 }
 0x2b5   : > { %v1389_v4 = vsub.f32 1.0, %v1388_v57  ;;  %v942_v57 = vmul.f32 %v3078_v26, %v940_v21 }
 0x2b7   : > { %v1390_v29 = vmul.f32 %v2178_v30, %v1389_v4  ;;  %v931_v4 = vmul.f32 %v930_v52, %v3081_v31 }
 0x2b9   : > { %v1391_v62 = vadd.f32 %v2178_v30, %v1390_v29 }
 0x2bb   : > { %v1395_v25 = vsel %vm1394_vm15, %v2178_v30, %v1391_v62  ;;  %v938_v30 = vadd.f32 %v936_v16, %v932_v55  ;;  %v941_v62 = vmul.f32 %v3095_v44, %v940_v21 }
 0x2bc   : > { %v1246_v7 = vpop.f32.mrf.mxu1  ;;  %v1400_v14 = vsel %vm1397_vm1, %v1399_v61, %v1395_v25  ;;  %v937_v61 = vadd.f32 %v935_v53, %v931_v4  ;;  %v952_v25 = vstv %s1937_s17 }
 0x2bd   : > { %v1252_v12 = vsel %vm983_vm0, %v1246_v7, -inf  ;;  %v1415_v17 = vmul.f32 %v3194_v56, %v1400_v14  ;;  %v944_v29 = vadd.f32 %v942_v57, %v938_v30 }
 0x2be   : > { %1253 = vmax.xlane.f32.xlu0 %v1252_v12  ;;  %v943_v13 = vadd.f32 %v941_v62, %v937_v61 }
 0x2bf   : > { %1969 = vst.msk [vmem:[%s3184_s24 + $0x30] sm:$0xff] %vm983_vm0, %v1415_v17  ;;  %1971 = vmatmul.msk.f32.vlgmr.msrb.gmra.mxu2 %vm983_vm0, %v1415_v17  ;;  %v950_v63 = vadd.f32 %v948_v34, %v944_v29 }
 0x2c0   : > { %v949_v12 = vadd.f32 %v947_v15, %v943_v13 }
 0x2c2   : > { %v953_v26 = vadd.f32 %v952_v25, %v949_v12 }
 0x2c4   : > { %v1249_v20 = vpop.f32.mrf.mxu1 }
 0x2c5   : > { %v1255_v50 = vsel %vm983_vm0, %v1249_v20, -inf }
 0x2c6   : > { %1373 = vmax.xlane.f32.xlu0 %v1372_v3  ;;  %1256 = vmax.xlane.f32.xlu2 %v1255_v50 }
 0x2ce   : > { %1151 = vadd.xlane.f32.xlu2 %v1150_v43 }
 0x331   : > { %v1254_v59 = vpop.xlane.xlu0 %1253 }
 0x332   : > { %v1258_v56 = vsub.f32 %v1246_v7, %v1254_v59  ;;  %v954_v7 = vadd.f32 %v952_v25, %v950_v63 }
 0x334   : > { %v1260_v60 = vmul.f32 1.442695, %v1258_v56  ;;  %1323 = vmatpush.msrb.mxu3 %v954_v7 }
 0x336   : > { %2181 = vpow2.f32 %v1260_v60  ;;  %1324 = vmatpush.msrb.mxu3 %v953_v26 }
 0x339   : > { %v1374_v11 = vpop.xlane.xlu0 %1373  ;;  %v1257_v22 = vpop.xlane.xlu2 %1256 }
 0x33a   : > { %v1376_v27 = vsub.f32 %v1366_v1, %v1374_v11  ;;  %v1259_v39 = vsub.f32 %v1249_v20, %v1257_v22 }
 0x33c   : > { %v3229_v0 = vpop.eup %2181  ;;  %v1379_v2 = vmul.f32 1.442695, %v1376_v27  ;;  %v1262_v9 = vmul.f32 1.442695, %v1259_v39 }
 0x33d   : > { %v1264_v35 = vsel %vm983_vm0, %v3229_v0, 0.0 }
 0x33e   : > { %2183 = vpow2.f32 %v1379_v2  ;;  %1265 = vadd.xlane.f32.xlu0 %v1264_v35 }
 0x33f   : > { %2185 = vpow2.f32 %v1262_v9 }
 0x341   : > { %v1152_v18 = vpop.xlane.xlu2 %1151 }
 0x342   : > { %2187 = vrcp.f32 %v1152_v18  ;;  %v1178_v42 = vand.u32 2147483648, %v1152_v18  ;;  %v1176_v46 = vand.u32 2147483647, %v1152_v18  ;;  %vm1172_vm3 = vweird.f32 %v1152_v18 }
 0x344   : > { %v3233_v23 = vpop.eup %2183  ;;  %v1179_v10 = vor.u32 1.1754944e-38, %v1178_v42  ;;  %vm1177_vm5 = vcmp.eq.f32.partialorder %v1176_v46, 8.507059e+37 }
 0x345   : > { %v3235_v5 = vpop.eup %2185  ;;  %v1384_v36 = vsel %vm983_vm0, %v3233_v23, 0.0 }
 0x346   : > { %1385 = vadd.xlane.f32.xlu0 %v1384_v36  ;;  %v1267_v37 = vsel %vm983_vm0, %v3235_v5, 0.0 }
 0x347   : > { %1268 = vadd.xlane.f32.xlu2 %v1267_v37 }
 0x348   : > { %v2188_v8 = vpop.eup %2187 }
 0x349   : > { %v1168_v19 = vmul.f32 %v2188_v8, %v1152_v18  ;;  %vm1173_vm2 = vweird.f32 %v2188_v8 }
 0x34a   : > { %vm1174_vm4 = vmor %vm1172_vm3, %vm1173_vm2 }
 0x34b   : > { %v1169_v40 = vsub.f32 1.0, %v1168_v19 }
 0x34d   : > { %v1170_v45 = vmul.f32 %v2188_v8, %v1169_v40 }
 0x34f   : > { %v1171_v47 = vadd.f32 %v2188_v8, %v1170_v45 }
 0x351   : > { %v1175_v48 = vsel %vm1174_vm4, %v2188_v8, %v1171_v47 }
 0x352   : > { %v1180_v28 = vsel %vm1177_vm5, %v1179_v10, %v1175_v48 }
 0x353   : > { %v1182_v51 = vmul.f32 %v2180_v6, %v1180_v28 }
 0x355   : > { %1954 = vst.msk [vmem:[%s3184_s24 + $0x18] sm:$0xff] %vm983_vm0, %v1182_v51  ;;  %1956 = vmatmul.msk.f32.gmra.mxu3 %vm983_vm0, %v1182_v51 }
 0x3b1   : > { %v1266_v14 = vpop.xlane.xlu0 %1265 }
 0x3b2   : > { %2189 = vrcp.f32 %v1266_v14  ;;  %v1281_v44 = vand.u32 2147483648, %v1266_v14  ;;  %v1279_v3 = vand.u32 2147483647, %v1266_v14  ;;  %vm1275_vm7 = vweird.f32 %v1266_v14 }
 0x3b4   : > { %v1282_v50 = vor.u32 1.1754944e-38, %v1281_v44  ;;  %vm1280_vm9 = vcmp.eq.f32.partialorder %v1279_v3, 8.507059e+37 }
 0x3b8   : > { %v2190_v31 = vpop.eup %2189 }
 0x3b9   : > { %v1271_v32 = vmul.f32 %v2190_v31, %v1266_v14  ;;  %v1386_v17 = vpop.xlane.xlu0 %1385  ;;  %vm1276_vm6 = vweird.f32 %v2190_v31 }
 0x3ba   : > { %2191 = vrcp.f32 %v1386_v17  ;;  %v1269_v41 = vpop.xlane.xlu2 %1268  ;;  %vm1277_vm8 = vmor %vm1275_vm7, %vm1276_vm6  ;;  %v1412_v27 = vand.u32 2147483648, %v1386_v17  ;;  %v1410_v9 = vand.u32 2147483647, %v1386_v17  ;;  %vm1406_vm12 = vweird.f32 %v1386_v17 }
 0x3bb   : > { %v1272_v38 = vsub.f32 1.0, %v1271_v32  ;;  %2193 = vrcp.f32 %v1269_v41  ;;  %v1295_v35 = vand.u32 2147483648, %v1269_v41  ;;  %v1293_v36 = vand.u32 2147483647, %v1269_v41 }
 0x3bc   : > { %v1413_v8 = vor.u32 1.1754944e-38, %v1412_v27  ;;  %vm1289_vm14 = vweird.f32 %v1269_v41  ;;  %vm1411_vm15 = vcmp.eq.f32.partialorder %v1410_v9, 8.507059e+37 }
 0x3bd   : > { %v1273_v1 = vmul.f32 %v2190_v31, %v1272_v38  ;;  %v1296_v19 = vor.u32 1.1754944e-38, %v1295_v35  ;;  %vm1294_vm2 = vcmp.eq.f32.partialorder %v1293_v36, 8.507059e+37 }
 0x3bf   : > { %v1274_v20 = vadd.f32 %v2190_v31, %v1273_v1 }
 0x3c0   : > { %v2192_v49 = vpop.eup %2191 }
 0x3c1   : > { %v2194_v6 = vpop.eup %2193  ;;  %v1402_v43 = vmul.f32 %v2192_v49, %v1386_v17  ;;  %v1278_v59 = vsel %vm1277_vm8, %v2190_v31, %v1274_v20  ;;  %vm1407_vm10 = vweird.f32 %v2192_v49 }
 0x3c2   : > { %v1285_v56 = vmul.f32 %v2194_v6, %v1269_v41  ;;  %v1283_v60 = vsel %vm1280_vm9, %v1282_v50, %v1278_v59  ;;  %vm1290_vm11 = vweird.f32 %v2194_v6  ;;  %vm1408_vm13 = vmor %vm1406_vm12, %vm1407_vm10 }
 0x3c3   : > { %v1403_v11 = vsub.f32 1.0, %v1402_v43  ;;  %v1298_v22 = vmul.f32 %v3229_v0, %v1283_v60  ;;  %vm1291_vm1 = vmor %vm1289_vm14, %vm1290_vm11 }
 0x3c4   : > { %v1286_v39 = vsub.f32 1.0, %v1285_v56 }
 0x3c5   : > { %v1404_v2 = vmul.f32 %v2192_v49, %v1403_v11  ;;  %1961 = vst.msk [vmem:[%s3184_s24 + $0x20] sm:$0xff] %vm983_vm0, %v1298_v22  ;;  %1963 = vmatmul.msk.f32.vlgmr.msrb.gmra.mxu3 %vm983_vm0, %v1298_v22 }
 0x3c6   : > { %v1287_v18 = vmul.f32 %v2194_v6, %v1286_v39 }
 0x3c7   : > { %v1405_v37 = vadd.f32 %v2192_v49, %v1404_v2 }
 0x3c8   : > { %v1288_v0 = vadd.f32 %v2194_v6, %v1287_v18 }
 0x3c9   : > { %v1409_v40 = vsel %vm1408_vm13, %v2192_v49, %v1405_v37 }
 0x3ca   : > { %v1292_v42 = vsel %vm1291_vm1, %v2194_v6, %v1288_v0  ;;  %v1414_v45 = vsel %vm1411_vm15, %v1413_v8, %v1409_v40 }
 0x3cb   : > { %v1297_v46 = vsel %vm1294_vm2, %v1296_v19, %v1292_v42  ;;  %v1416_v47 = vmul.f32 %v3233_v23, %v1414_v45 }
 0x3cc   : > { %v1299_v10 = vmul.f32 %v3235_v5, %v1297_v46 }
 0x3cd   : > { %1970 = vst.msk [vmem:[%s3184_s24 + $0x38] sm:$0xff] %vm983_vm0, %v1416_v47  ;;  %1972 = vmatmul.msk.f32.gmra.mxu2 %vm983_vm0, %v1416_v47 }
 0x3ce   : > { %1962 = vst.msk [vmem:[%s3184_s24 + $0x28] sm:$0xff] %vm983_vm0, %v1299_v10  ;;  %1964 = vmatmul.msk.f32.gmra.mxu3 %vm983_vm0, %v1299_v10 }
 0x3cf   : > { %2432 = shalt.err (!%p2429_p1)
}
 0x3d0   : > { %s3438_s24 = smov 128   ;;  %s3439_s19 = smov 8   ;;  %v1209_v23 = vpop.f32.mrf.mxu3  ;;  %v1443_v62 = vpop.f32.mrf.mxu2 }
 0x3d1   : > { %2056 = dma.vmem_to_hbm [thread:$0]  (%p2686_p0), %s1602_s9, 1024, %s1604_s1, %s1570_s26, %s3438_s24, %s3438_s24, %s3439_s19  }
 0x3d2   : > { %s3285_s17 = sld [smem:[#allocation18]] }
 0x3d3   : > { %s3287_s12 = sld [smem:[#allocation18 + $0x80]] }
 0x3d4   : > { %s3289_s15 = sld [smem:[#allocation18 + $0x100]] }
 0x3d5   : > { %s3291_s29 = sld [smem:[#allocation18 + $0x180]] }
 0x3d6   : > { %s3293_s21 = sld [smem:[#allocation18 + $0x1]] }
 0x3d7   : > { %s3295_s27 = sld [smem:[#allocation18 + $0x81]] }
 0x3d8   : > { %s3297_s13 = sld [smem:[#allocation18 + $0x101]]  ;;  %v1212_v52 = vpop.f32.mrf.mxu3  ;;  %v1450_v54 = vstv %s3285_s17 }
 0x3d9   : > { %s3299_s14 = sld [smem:[#allocation18 + $0x181]]  ;;  %v1478_v55 = vstv %s3287_s12  ;;  %v1451_v53 = vmul.f32 %v1450_v54, %v3216_v58  ;;  %v1452_v19 = vmul.f32 %v1450_v54, %v3218_v24 }
 0x3da   : > { %s3301_s9 = sld [smem:[#allocation18 + $0x3]]  ;;  %v1507_v16 = vstv %s3289_s15  ;;  %v1479_v29 = vmul.f32 %v1478_v55, %v3216_v58  ;;  %v1480_v40 = vmul.f32 %v1478_v55, %v3218_v24 }
 0x3db   : > { %s3303_s1 = sld [smem:[#allocation18 + $0x83]]  ;;  %v1536_v21 = vstv %s3291_s29  ;;  %v1508_v34 = vmul.f32 %v1507_v16, %v3216_v58  ;;  %v1509_v42 = vmul.f32 %v1507_v16, %v3218_v24 }
 0x3dc   : > { %s3305_s26 = sld [smem:[#allocation18 + $0x103]]  ;;  %v1454_v5 = vstv %s3293_s21  ;;  %v1537_v61 = vmul.f32 %v1536_v21, %v3216_v58  ;;  %v1538_v45 = vmul.f32 %v1536_v21, %v3218_v24 }
 0x3dd   : > { %s3307_s7 = sld [smem:[#allocation18 + $0x183]]  ;;  %v1482_v48 = vstv %s3295_s27  ;;  %v1455_v30 = vmul.f32 %v1454_v5, %v1209_v23  ;;  %v1456_v43 = vmul.f32 %v1454_v5, %v1212_v52 }
 0x3de   : > { %s3309_s30 = sld [smem:[#allocation18 + $0x2]]  ;;  %v1511_v28 = vstv %s3297_s13  ;;  %v1483_v57 = vmul.f32 %v1482_v48, %v1209_v23  ;;  %v1484_v59 = vmul.f32 %v1482_v48, %v1212_v52 }
 0x3df   : > { %s3311_s18 = sld [smem:[#allocation18 + $0x82]]  ;;  %v1540_v51 = vstv %s3299_s14  ;;  %v1512_v33 = vmul.f32 %v1511_v28, %v1209_v23  ;;  %v1457_v31 = vadd.f32 %v1455_v30, %v1451_v53  ;;  %v1513_v56 = vmul.f32 %v1511_v28, %v1212_v52 }
 0x3e0   : > { %s3313_s24 = sld [smem:[#allocation18 + $0x102]]  ;;  %v1541_v4 = vmul.f32 %v1540_v51, %v1209_v23  ;;  %v1466_v63 = vstv %s3301_s9  ;;  %v1485_v32 = vadd.f32 %v1483_v57, %v1479_v29  ;;  %v1542_v60 = vmul.f32 %v1540_v51, %v1212_v52 }
 0x3e1   : > { %s3315_s19 = sld [smem:[#allocation18 + $0x182]]  ;;  %v1494_v25 = vstv %s3303_s1  ;;  %v1514_v17 = vadd.f32 %v1512_v33, %v1508_v34  ;;  %v1467_v44 = vmul.f32 %v1466_v63, %v1443_v62  ;;  %v1458_v28 = vadd.f32 %v1456_v43, %v1452_v19 }
 0x3e2   : > { %s3325_s4 = sld [smem:[#allocation20]]  ;;  %v1523_v13 = vstv %s3305_s26  ;;  %v1543_v41 = vadd.f32 %v1541_v4, %v1537_v61  ;;  %v1495_v1 = vmul.f32 %v1494_v25, %v1443_v62  ;;  %v1486_v51 = vadd.f32 %v1484_v59, %v1480_v40 }
 0x3e3   : > { %s3327_s0 = sld [smem:[#allocation20 + $0x1]]  ;;  %v1552_v15 = vstv %s3307_s7  ;;  %v1524_v58 = vmul.f32 %v1523_v13, %v1443_v62  ;;  %v1515_v52 = vadd.f32 %v1513_v56, %v1509_v42  ;;  %v1544_v30 = vadd.f32 %v1542_v60, %v1538_v45 }
 0x3e4   : > { %s3329_s17 = sld [smem:[#allocation20 + $0x2]]  ;;  %v1460_v7 = vstv %s3309_s30  ;;  %v1553_v3 = vmul.f32 %v1552_v15, %v1443_v62 }
 0x3e5   : > { %s3335_s12 = sld [smem:[#allocation20 + $0x3]]  ;;  %v1488_v12 = vstv %s3311_s18 }
 0x3e6   : > { %v1517_v26 = vstv %s3313_s24 }
 0x3e7   : > { %v1546_v14 = vstv %s3315_s19  ;;  %s3483_s19 = sld [smem:[#allocation45_spill]] }
 0x3e8   : > { %v1472_v2 = vstv %s3325_s4 }
 0x3e9   : > { %v1500_v9 = vstv %s3327_s0  ;;  %s3354_s0 = scalar_lea.vmem [#allocation21], %s2804_s25  ;;  %s3482_s25 = sshll.u32 %s2634_s28, 6 }
 0x3ea   : > { %v1529_v35 = vstv %s3329_s17  ;;  %s1583_s29 = sshll.u32 %s3354_s0, 4  ;;  %s1565_s28 = scalar_lea.sflag [#allocation4], %s2801_s20  ;;  %s1584_s29 = int_to_ptr.vmem [resolvable:$true] %s1583_s29 }
 0x3eb   : > { %v1558_v18 = vstv %s3335_s12 }
 0x3ed   : > { %s1582_s15 = scalar_lea.hbm %s3483_s19, %s3482_s25  ;;  %s2453_s1 = scalar_lea.hbm %s3483_s19, 128 }
 0x3ee   : > { %s1585_s21 = sshll.u32 %s1582_s15, 4  ;;  %s1586_s21 = int_to_ptr.hbm [resolvable:$true] %s1585_s21 }
 0x3ef   : > { %s2447_s27 = sshra.s32 %s1586_s21, 4  ;;  %s2448_s27 = int_to_ptr.hbm [resolvable:$true] %s2447_s27 }
 0x3f0   : > { %s2449_s13 = scalar_lea.hbm %s2448_s27, 64  ;;  %p2454_p11 = scmp.lt.s32.totalorder %s2448_s27, %s3483_s19 }
 0x3f1   : > { %p2450_p7 = scmp.ne.s32.totalorder %s2448_s27, %s2449_s13  ;;  %p2455_p12 = scmp.lt.s32.totalorder %s2453_s1, %s2449_s13 }
 0x3f3   : > { %p2451_p10 = pnand %p2450_p7, %p2686_p0  ;;  %p2456_p3 = por %p2455_p12, %p2454_p11 }
 0x3f5   : > { %p2452_p6 = pneg %p2451_p10 }
 0x3f7   : > { %p2457_p8 = pnand %p2456_p3, %p2452_p6 }
 0x448   : > { %v1326_v38 = vpop.f32.mrf.mxu3 }
 0x449   : > { %v1461_v20 = vmul.f32 %v1460_v7, %v1326_v38  ;;  %v1489_v49 = vmul.f32 %v1488_v12, %v1326_v38  ;;  %v1518_v50 = vmul.f32 %v1517_v26, %v1326_v38  ;;  %v1547_v6 = vmul.f32 %v1546_v14, %v1326_v38 }
 0x44b   : > { %v1463_v11 = vadd.f32 %v1461_v20, %v1457_v31  ;;  %v1491_v22 = vadd.f32 %v1489_v49, %v1485_v32  ;;  %v1520_v27 = vadd.f32 %v1518_v50, %v1514_v17  ;;  %v1549_v39 = vadd.f32 %v1547_v6, %v1543_v41 }
 0x44d   : > { %v1469_v36 = vadd.f32 %v1467_v44, %v1463_v11  ;;  %v1497_v37 = vadd.f32 %v1495_v1, %v1491_v22  ;;  %v1526_v8 = vadd.f32 %v1524_v58, %v1520_v27  ;;  %v1555_v0 = vadd.f32 %v1553_v3, %v1549_v39 }
 0x44f   : > { %v1473_v46 = vadd.f32 %v1472_v2, %v1469_v36  ;;  %v1501_v47 = vadd.f32 %v1500_v9, %v1497_v37  ;;  %v1530_v10 = vadd.f32 %v1529_v35, %v1526_v8  ;;  %v1559_v5 = vadd.f32 %v1558_v18, %v1555_v0 }
 0x450   : > { %v1446_v23 = vpop.f32.mrf.mxu2 }
 0x451   : > { %v1329_v48 = vpop.f32.mrf.mxu3  ;;  %1475 = vst.msk [vmem:[%s3354_s0] sm:$0xff] %vm983_vm0, %v1473_v46  ;;  %v1468_v21 = vmul.f32 %v1466_v63, %v1446_v23  ;;  %v1496_v57 = vmul.f32 %v1494_v25, %v1446_v23  ;;  %v1525_v33 = vmul.f32 %v1523_v13, %v1446_v23  ;;  %v1554_v4 = vmul.f32 %v1552_v15, %v1446_v23 }
 0x452   : > { %v1462_v24 = vmul.f32 %v1460_v7, %v1329_v48  ;;  %v1490_v54 = vmul.f32 %v1488_v12, %v1329_v48  ;;  %v1519_v55 = vmul.f32 %v1517_v26, %v1329_v48  ;;  %v1548_v16 = vmul.f32 %v1546_v14, %v1329_v48  ;;  %1981 = vst.msk [vmem:[%s3354_s0 + $0x10] sm:$0xff] %vm983_vm0, %v1501_v47 }
 0x453   : > { %1988 = vst.msk [vmem:[%s3354_s0 + $0x20] sm:$0xff] %vm983_vm0, %v1530_v10 }
 0x454   : > { %v1464_v53 = vadd.f32 %v1462_v24, %v1458_v28  ;;  %v1492_v29 = vadd.f32 %v1490_v54, %v1486_v51  ;;  %v1521_v34 = vadd.f32 %v1519_v55, %v1515_v52  ;;  %v1550_v61 = vadd.f32 %v1548_v16, %v1544_v30  ;;  %1995 = vst.msk [vmem:[%s3354_s0 + $0x30] sm:$0xff] %vm983_vm0, %v1559_v5 }
 0x456   : > { %v1470_v62 = vadd.f32 %v1468_v21, %v1464_v53  ;;  %v1498_v63 = vadd.f32 %v1496_v57, %v1492_v29  ;;  %v1527_v25 = vadd.f32 %v1525_v33, %v1521_v34  ;;  %v1556_v13 = vadd.f32 %v1554_v4, %v1550_v61 }
 0x458   : > { %v1474_v15 = vadd.f32 %v1472_v2, %v1470_v62  ;;  %v1502_v7 = vadd.f32 %v1500_v9, %v1498_v63  ;;  %v1531_v12 = vadd.f32 %v1529_v35, %v1527_v25  ;;  %v1560_v26 = vadd.f32 %v1558_v18, %v1556_v13 }
 0x45a   : > { %1476 = vst.msk [vmem:[%s3354_s0 + $0x8] sm:$0xff] %vm983_vm0, %v1474_v15 }
 0x45b   : > { %1982 = vst.msk [vmem:[%s3354_s0 + $0x18] sm:$0xff] %vm983_vm0, %v1502_v7 }
 0x45c   : > { %1989 = vst.msk [vmem:[%s3354_s0 + $0x28] sm:$0xff] %vm983_vm0, %v1531_v12 }
 0x45d   : > { %1996 = vst.msk [vmem:[%s3354_s0 + $0x38] sm:$0xff] %vm983_vm0, %v1560_v26 }
 0x45e   : > { %2460 = shalt.err (!%p2457_p8)
}
 0x45f   : > { %s3484_s20 = smov 8   ;;  %s3485_s30 = smov 128  }
 0x460   : > { %2055 = dma.vmem_to_hbm [thread:$0]  (%p2686_p0), %s1584_s29, 1024, %s1586_s21, %s1565_s28, %s3485_s30, %s3485_s30, %s3484_s20  }
 0x461 PF: > { %s3486_s18 = sld [smem:[#allocation34_spill]] }
 0x462   : > { %s3488_s12 = sld [smem:[#allocation35_spill]] }
 0x467   : > { %s1618_s0 = sand.u32 1, %s3486_s18  }
 0x468   : > { %p3489_p9 = scmp.ge.s32.totalorder %s3488_s12, 2  ;;  %s1619_s25 = scalar_lea.sflag [#allocation4], %s1618_s0 }
 0x46a   : > { %p2095_p2 = pnand %p3489_p9, %p2692_p4 }
 0x46c   : > { %p2096_p5 = pneg %p2095_p2 }
 0x46e   : > { %2510 = dma.done.wait (%p2096_p5), %s1619_s25, 1024  }
 0x46f   : > { %2512 = vsyncadd (%p2096_p5), %s1619_s25, 4294966272  ;;  %s1629_s4 = scalar_lea.sflag [#allocation23], %s1618_s0 }
 0x470   : > { %2514 = dma.done.wait (%p2096_p5), %s1629_s4, 1024  }
 0x471   : > { %2516 = vsyncadd (%p2096_p5), %s1629_s4, 4294966272  ;;  %s3490_s24 = sld [smem:[#allocation36_spill]]  ;;  %s3492_s21 = smov %s2523_s22 }
 0x472   : > { %s3491_s16 = sld [smem:[#allocation37_spill]]  ;;  %s3493_s22 = smov %s2527_s23 }
 0x477   : > { %p37_p0 = scmp.ge.s32.totalorder %s3490_s24, 4  }
 0x478   : > { %s3494_s23 = smov %s3491_s16 }
 0x479   :  { %39 = sbr.rel (!%p37_p0) target bundleno = 22 (0x16), region = 199 }
 0x47e   :  { %1635 = vsyncpa [#allocation3], 1 }
 0x47f   :  { %1637 = vsyncpa [#allocation3 + $0x1], 1 }
 0x480   :  { %1638 = vsyncpa [#allocation8], 1 }
 0x481   :  { %1640 = vsyncpa [#allocation8 + $0x1], 1 }
 0x482   :  { %1641 = vsyncpa [#allocation4], 1 }
 0x483   :  { %1643 = vsyncpa [#allocation4 + $0x1], 1 }
 0x484   :  { %1644 = vsyncpa [#allocation23], 1 }
 0x485   :  { %1646 = vsyncpa [#allocation23 + $0x1], 1 }
 0x486   :  { %1647 = vsyncpa [#allocation5], 1 }
 0x487   :  { %1649 = vsyncpa [#allocation5 + $0x1], 1 }
 0x488   :  { %1650 = vsyncpa [#allocation12], 1 }
 0x489   :  { %1651 = vsyncpa [#allocation16], 1 }
 0x48a   :  { %1652 = vsyncpa [#allocation6], 1 }
 0x48b   :  { %1654 = vsyncpa [#allocation6 + $0x1], 1 }
 0x48c   :  { %1655 = vsyncpa [#allocation19], 1 }

</bundles_post_ra>
